<compile_context>
chip_gen: v5e
topology: v5e:2x2
jax: 0.10.0
libtpu: 0.0.40
codegen_flags: <defaults>
</compile_context>

<pallas_src>
import functools

import jax
import jax.numpy as jnp
from jax.experimental import pallas as pl
from jax.experimental.pallas import tpu as pltpu


# ----------------------------------------------------------------------------
# Fused kernel: 8 hex-conv blocks (activation carried in VMEM across the layer
# grid axis) + linear head, with the head weight DMA overlapped with the convs.
# ----------------------------------------------------------------------------
def _fused_kernel(x_ref, wc_ref, bc_ref, wlin_hbm, blin_ref, o_ref,
                  pad_ref, tap_ref, y_ref, wlin_vmem, dma_sem,
                  *, N, H, W, C, L, F):
    l = pl.program_id(0)
    HW = H * W

    @pl.when(l == 0)
    def _init():
        # Kick off the 8 MiB head-weight stream; it runs concurrently with the
        # whole conv stack and is awaited just before the head matmul.
        pltpu.make_async_copy(wlin_hbm, wlin_vmem, dma_sem).start()
        # Zero the padded scratch once (borders stay zero forever) and load the
        # channel-padded input into its interior.
        pad_ref[...] = jnp.zeros_like(pad_ref)
        pad_ref[:, 1:1 + H, 1:1 + W, :] = x_ref[...]

    def tap(dr, dc):
        # Shifted window of the zero-bordered activation.
        return pad_ref[:, 1 + dr:1 + dr + H, 1 + dc:1 + dc + W, :]

    # Column-parity mask (offset-column hexagonal addressing).
    col = jax.lax.broadcasted_iota(jnp.int32, (N, H, W, C), 2)
    even = (col % 2) == 0  # even-index columns sit half a cell higher

    taps = (
        tap(0, 0),                                  # centre
        tap(-1, 0),                                 # up
        tap(1, 0),                                  # down
        jnp.where(even, tap(-1, -1), tap(0, -1)),   # upper-left
        jnp.where(even, tap(0, -1), tap(1, -1)),    # lower-left
        jnp.where(even, tap(-1, 1), tap(0, 1)),     # upper-right
        jnp.where(even, tap(0, 1), tap(1, 1)),      # lower-right
    )

    # Stage the (N*H*W, 7*C) tap matrix and run ONE K=448 MXU dot per layer.
    for t, s in enumerate(taps):
        tap_ref[:, t * C:(t + 1) * C] = s.reshape(N * HW, C)

    out = jnp.dot(tap_ref[...], wc_ref[0], preferred_element_type=jnp.float32)
    out = jnp.maximum(out + bc_ref[0], 0.0)          # (N*H*W, C)

    @pl.when(l < L - 1)
    def _carry():
        # Carry the activation for the next layer (interior only).
        pad_ref[:, 1:1 + H, 1:1 + W, :] = out.reshape(N, H, W, C)

    @pl.when(l == L - 1)
    def _head():
        # NHWC-ordered per-position activations for the head.
        y_ref[...] = out.reshape(N, HW, C)
        # Head weight must be resident now; by this point it has streamed in
        # behind the conv stack.
        pltpu.make_async_copy(wlin_hbm, wlin_vmem, dma_sem).wait()

        def body(r, acc):
            yr = y_ref[:, pl.ds(r, 1), :].reshape(N, C)      # (N, C)
            return acc + jnp.dot(yr, wlin_vmem[r],
                                 preferred_element_type=jnp.float32)

        acc = jax.lax.fori_loop(0, HW, body, jnp.zeros((N, F), jnp.float32))
        o_ref[...] = jnp.maximum(acc + blin_ref[...], 0.0).astype(o_ref.dtype)


def forward(x_nchw, w_stack, b_stack, w_lin_hwcf, b_lin):
    """x_nchw: (N, C_in, H, W); w_stack: (L, 7, C, C) (layer-0 in-channels
    zero-padded to C); b_stack: (L, 1, C); w_lin_hwcf: (H*W, C, F) head weight
    with rows pre-permuted from the NCHW-flatten convention; b_lin: (F,)."""
    x = jnp.transpose(x_nchw, (0, 2, 3, 1)).astype(jnp.float32)   # NCHW -> NHWC (tiny)
    c = w_stack.shape[-1]
    c_in = x.shape[-1]
    if c_in < c:                                    # pad input channels; the
        x = jnp.pad(x, ((0, 0), (0, 0), (0, 0), (0, c - c_in)))  # extra weight rows are 0
    n, h, w, _ = x.shape
    num_layers, n_taps = w_stack.shape[0], w_stack.shape[1]
    f = w_lin_hwcf.shape[-1]
    assert w_lin_hwcf.shape == (h * w, c, f), w_lin_hwcf.shape
    assert b_stack.shape == (num_layers, 1, c), b_stack.shape

    wc = w_stack.reshape(num_layers, n_taps * c, c)   # (L, 7*C, C), row = t*C + c_in
    blin2 = b_lin.reshape(1, f)

    kernel = functools.partial(_fused_kernel, N=n, H=h, W=w, C=c,
                               L=num_layers, F=f)
    return pl.pallas_call(
        kernel,
        out_shape=jax.ShapeDtypeStruct((n, f), jnp.float32),
        grid_spec=pltpu.PrefetchScalarGridSpec(
            num_scalar_prefetch=0,
            grid=(num_layers,),
            in_specs=[
                pl.BlockSpec((n, h, w, c), lambda l: (0, 0, 0, 0)),
                pl.BlockSpec((1, n_taps * c, c), lambda l: (l, 0, 0)),
                pl.BlockSpec((1, 1, c), lambda l: (l, 0, 0)),
                pl.BlockSpec(memory_space=pl.ANY),            # head weight: manual DMA
                pl.BlockSpec((1, f), lambda l: (0, 0)),
            ],
            out_specs=pl.BlockSpec((n, f), lambda l: (0, 0)),
            scratch_shapes=[
                pltpu.VMEM((n, h + 2, w + 2, c), jnp.float32),     # padded activation carry
                pltpu.VMEM((n * h * w, n_taps * c), jnp.float32),  # staged tap matrix
                pltpu.VMEM((n, h * w, c), jnp.float32),            # last-layer activations
                pltpu.VMEM((h * w, c, f), jnp.float32),            # streamed head weight (8 MiB)
                pltpu.SemaphoreType.DMA,
            ],
        ),
        # The layer axis is a sequential carry; single-TC on v7x is an explicit
        # trade-off vs. the removed per-batch weight re-DMA (see review).
        compiler_params=pltpu.CompilerParams(
            dimension_semantics=("arbitrary",)),
    )(x, wc, b_stack, w_lin_hwcf, blin2)


# ----------------------------------------------------------------------------
# Pure-JAX reference (same hexagdly parity convention) for a numerics check.
# ----------------------------------------------------------------------------
def _ref_forward(x_nchw, conv_params, w_lin_nchw, b_lin):
    x = jnp.transpose(x_nchw, (0, 2, 3, 1)).astype(jnp.float32)
    for wgt, bia in conv_params:
        n, h, w, _ = x.shape
        xp = jnp.pad(x, ((0, 0), (1, 1), (1, 1), (0, 0)))

        def tap(dr, dc):
            return xp[:, 1 + dr:1 + dr + h, 1 + dc:1 + dc + w, :]

        col = jax.lax.broadcasted_iota(jnp.int32, (n, h, w, 1), 2)
        even = (col % 2) == 0
        taps = (
            tap(0, 0), tap(-1, 0), tap(1, 0),
            jnp.where(even, tap(-1, -1), tap(0, -1)),
            jnp.where(even, tap(0, -1), tap(1, -1)),
            jnp.where(even, tap(-1, 1), tap(0, 1)),
            jnp.where(even, tap(0, 1), tap(1, 1)),
        )
        acc = sum(jnp.einsum("nhwc,cd->nhwd", t, wgt[i])
                  for i, t in enumerate(taps))
        x = jnp.maximum(acc + bia, 0.0)
    y = jnp.transpose(x, (0, 3, 1, 2)).reshape(x.shape[0], -1)   # NCHW flatten
    return jnp.maximum(y @ w_lin_nchw + b_lin, 0.0)


if __name__ == "__main__":
    # Small shapes consistent with the module: obs_space.shape = (C_in, H, W).
    N, C_IN, H, W = 2, 4, 8, 8
    CONVS = 64          # convs_per_layer
    N_RESID = 7         # n_residual_layers
    N_LAYERS = 1 + N_RESID
    FEATURES = 512      # features_dim
    N_TAPS = 7          # hexagdly kernel_size=1 -> centre + 6 hex neighbours

    key = jax.random.PRNGKey(0)
    key, k_obs = jax.random.split(key)
    x_nchw = jax.random.normal(k_obs, (N, C_IN, H, W), dtype=jnp.float32)

    # Synthetic per-block hex-conv parameters: weight (7, Cin, Cout), bias (Cout,).
    # TODO(synk): loading a real hexagdly checkpoint needs a tested repack of its
    # separate sub-kernel tensors into this (7, Cin, Cout) tap order.
    conv_params = []
    c_prev = C_IN
    for _ in range(N_LAYERS):
        key, kw, kb = jax.random.split(key, 3)
        wgt = jax.random.normal(kw, (N_TAPS, c_prev, CONVS), jnp.float32) / jnp.sqrt(
            float(N_TAPS * c_prev))
        bia = jax.random.normal(kb, (CONVS,), jnp.float32) * 0.01
        conv_params.append((wgt, bia))
        c_prev = CONVS

    n_params = sum(int(wgt.size) + int(bia.size) for wgt, bia in conv_params)
    print(f"Parameter count {n_params}")  # CNN params, as the module prints

    # Stack block weights for the fused kernel: zero-pad layer 0's input channels
    # to CONVS so every layer shares the (7, CONVS, CONVS) shape.  Done ONCE here.
    w_stack = jnp.stack([
        jnp.pad(wgt, ((0, 0), (0, CONVS - wgt.shape[1]), (0, 0)))
        for wgt, _ in conv_params])                                 # (8, 7, 64, 64)
    b_stack = jnp.stack([bia for _, bia in conv_params]).reshape(N_LAYERS, 1, CONVS)

    # Linear head.  The PyTorch module flattens NCHW; generate the weight in that
    # convention and permute its rows ONCE host-side so the kernel consumes the
    # NHWC conv output directly.  Kept 3-D (H*W, C, F) for the per-position loop.
    n_flatten = CONVS * H * W
    key, kw, kb = jax.random.split(key, 3)
    w_lin_nchw = jax.random.normal(kw, (n_flatten, FEATURES), jnp.float32) / jnp.sqrt(
        float(n_flatten))
    b_lin = jax.random.normal(kb, (FEATURES,), jnp.float32) * 0.01
    w_lin_hwcf = (
        w_lin_nchw.reshape(CONVS, H, W, FEATURES)
        .transpose(1, 2, 0, 3)
        .reshape(H * W, CONVS, FEATURES))

    fwd = jax.jit(forward)
    out = fwd(x_nchw, w_stack, b_stack, w_lin_hwcf, b_lin)
    out = jax.block_until_ready(out)

    ref = jax.block_until_ready(_ref_forward(x_nchw, conv_params, w_lin_nchw, b_lin))

    assert out.shape == (N, FEATURES), out.shape
    assert out.dtype == jnp.float32
    assert bool(jnp.all(out >= 0.0))  # final ReLU
    assert bool(jnp.allclose(out, ref, rtol=5e-2, atol=5e-2)), (
        "max abs diff vs reference: %f" % float(jnp.max(jnp.abs(out - ref))))
    print("KERNEL_OK")
</pallas_src>

<mosaic_0001>
module attributes {stable_mosaic.version = 11 : i64} {
  func.func @_fused_kernel(%arg0: i32, %arg1: memref<2x8x8x64xf32, #tpu.memory_space<vmem>>, %arg2: memref<1x448x64xf32, #tpu.memory_space<vmem>>, %arg3: memref<1x1x64xf32, #tpu.memory_space<vmem>>, %arg4: memref<64x64x512xf32, #tpu.memory_space<any>>, %arg5: memref<1x512xf32, #tpu.memory_space<vmem>>, %arg6: memref<2x512xf32, #tpu.memory_space<vmem>>, %arg7: memref<2x10x10x64xf32, #tpu.memory_space<vmem>>, %arg8: memref<128x448xf32, #tpu.memory_space<vmem>>, %arg9: memref<2x64x64xf32, #tpu.memory_space<vmem>>, %arg10: memref<64x64x512xf32, #tpu.memory_space<vmem>>, %arg11: memref<!tpu.dma_semaphore, #tpu.memory_space<semaphore_mem>>) attributes {dimension_semantics = [#tpu.dimension_semantics<arbitrary>], iteration_bounds = array<i64: 8>, scalar_prefetch = 0 : i64, scratch_operands = 5 : i64, tpu.core_type = #tpu.core_type<tc>, window_params = [{pipeline_mode = #tpu.pipeline_mode<synchronous>, transform_indices = @transform_0, window_bounds = array<i64: 2, 8, 8, 64>}, {transform_indices = @transform_1, window_bounds = array<i64: 1, 448, 64>}, {transform_indices = @transform_2, window_bounds = array<i64: 1, 1, 64>}, {}, {pipeline_mode = #tpu.pipeline_mode<synchronous>, transform_indices = @transform_4, window_bounds = array<i64: 1, 512>}, {pipeline_mode = #tpu.pipeline_mode<synchronous>, transform_indices = @transform_5, window_bounds = array<i64: 2, 512>}]} {
    %c0_i32 = arith.constant 0 : i32
    %0 = arith.cmpi eq, %arg0, %c0_i32 : i32
    %1 = arith.extui %0 : i1 to i32
    %c0_i32_0 = arith.constant 0 : i32
    %2 = arith.cmpi ne, %1, %c0_i32_0 : i32
    scf.if %2 {
      tpu.enqueue_dma source(%arg4 : memref<64x64x512xf32, #tpu.memory_space<any>>) target(%arg10 : memref<64x64x512xf32, #tpu.memory_space<vmem>>) target_semaphore(%arg11 : memref<!tpu.dma_semaphore, #tpu.memory_space<semaphore_mem>>)
      %cst_67 = arith.constant 0.000000e+00 : f32
      %67 = vector.broadcast %cst_67 : f32 to vector<2x10x10x64xf32>
      %c0_68 = arith.constant 0 : index
      %c0_69 = arith.constant 0 : index
      %c0_70 = arith.constant 0 : index
      %c0_71 = arith.constant 0 : index
      %68 = vector.load %arg7[%c0_68, %c0_69, %c0_70, %c0_71] : memref<2x10x10x64xf32, #tpu.memory_space<vmem>>, vector<2x10x10x64xf32>
      tpu.vector_store %arg7[%c0_68, %c0_69, %c0_70, %c0_71], %67 {strides = array<i32>} : memref<2x10x10x64xf32, #tpu.memory_space<vmem>>, vector<2x10x10x64xf32>,
      %c0_72 = arith.constant 0 : index
      %c0_73 = arith.constant 0 : index
      %c0_74 = arith.constant 0 : index
      %c0_75 = arith.constant 0 : index
      %69 = vector.load %arg1[%c0_72, %c0_73, %c0_74, %c0_75] : memref<2x8x8x64xf32, #tpu.memory_space<vmem>>, vector<2x8x8x64xf32>
      %c0_76 = arith.constant 0 : index
      %c1_77 = arith.constant 1 : index
      %c1_78 = arith.constant 1 : index
      %c0_79 = arith.constant 0 : index
      %70 = vector.load %arg7[%c0_76, %c1_77, %c1_78, %c0_79] : memref<2x10x10x64xf32, #tpu.memory_space<vmem>>, vector<2x8x8x64xf32>
      tpu.vector_store %arg7[%c0_76, %c1_77, %c1_78, %c0_79], %69 {strides = array<i32>} : memref<2x10x10x64xf32, #tpu.memory_space<vmem>>, vector<2x8x8x64xf32>,
    } else {
    }
    %3 = tpu.iota {dimensions = array<i32: 2>} : vector<2x8x8x64xi32>
    %c2_i32 = arith.constant 2 : i32
    %c0_i32_1 = arith.constant 0 : i32
    %4 = arith.cmpi eq, %c2_i32, %c0_i32_1 : i32
    %c1_i32 = arith.constant 1 : i32
    %5 = arith.select %4, %c1_i32, %c2_i32 : i32
    %6 = vector.broadcast %5 : i32 to vector<2x8x8x64xi32>
    %7 = arith.remsi %3, %6 : vector<2x8x8x64xi32>
    %c0_i32_2 = arith.constant 0 : i32
    %8 = vector.broadcast %c0_i32_2 : i32 to vector<2x8x8x64xi32>
    %9 = arith.cmpi ne, %7, %8 : vector<2x8x8x64xi32>
    %c0_i32_3 = arith.constant 0 : i32
    %10 = vector.broadcast %c0_i32_3 : i32 to vector<2x8x8x64xi32>
    %11 = arith.cmpi slt, %7, %10 : vector<2x8x8x64xi32>
    %c0_i32_4 = arith.constant 0 : i32
    %12 = arith.cmpi slt, %5, %c0_i32_4 : i32
    %13 = vector.broadcast %12 : i1 to vector<2x8x8x64xi1>
    %14 = vector.broadcast %13 : vector<2x8x8x64xi1> to vector<2x8x8x64xi1>
    %15 = arith.xori %11, %14 : vector<2x8x8x64xi1>
    %16 = arith.andi %15, %9 : vector<2x8x8x64xi1>
    %17 = vector.broadcast %5 : i32 to vector<2x8x8x64xi32>
    %18 = arith.addi %7, %17 : vector<2x8x8x64xi32>
    %19 = arith.select %16, %18, %7 : vector<2x8x8x64xi1>, vector<2x8x8x64xi32>
    %c0_i32_5 = arith.constant 0 : i32
    %20 = vector.broadcast %c0_i32_5 : i32 to vector<2x8x8x64xi32>
    %21 = arith.cmpi eq, %19, %20 : vector<2x8x8x64xi32>
    %c0 = arith.constant 0 : index
    %c1 = arith.constant 1 : index
    %c1_6 = arith.constant 1 : index
    %c0_7 = arith.constant 0 : index
    %22 = vector.load %arg7[%c0, %c1, %c1_6, %c0_7] : memref<2x10x10x64xf32, #tpu.memory_space<vmem>>, vector<2x8x8x64xf32>
    %c0_8 = arith.constant 0 : index
    %c0_9 = arith.constant 0 : index
    %c1_10 = arith.constant 1 : index
    %c0_11 = arith.constant 0 : index
    %23 = vector.load %arg7[%c0_8, %c0_9, %c1_10, %c0_11] : memref<2x10x10x64xf32, #tpu.memory_space<vmem>>, vector<2x8x8x64xf32>
    %c0_12 = arith.constant 0 : index
    %c2 = arith.constant 2 : index
    %c1_13 = arith.constant 1 : index
    %c0_14 = arith.constant 0 : index
    %24 = vector.load %arg7[%c0_12, %c2, %c1_13, %c0_14] : memref<2x10x10x64xf32, #tpu.memory_space<vmem>>, vector<2x8x8x64xf32>
    %c0_15 = arith.constant 0 : index
    %c0_16 = arith.constant 0 : index
    %c0_17 = arith.constant 0 : index
    %c0_18 = arith.constant 0 : index
    %25 = vector.load %arg7[%c0_15, %c0_16, %c0_17, %c0_18] : memref<2x10x10x64xf32, #tpu.memory_space<vmem>>, vector<2x8x8x64xf32>
    %c0_19 = arith.constant 0 : index
    %c1_20 = arith.constant 1 : index
    %c0_21 = arith.constant 0 : index
    %c0_22 = arith.constant 0 : index
    %26 = vector.load %arg7[%c0_19, %c1_20, %c0_21, %c0_22] : memref<2x10x10x64xf32, #tpu.memory_space<vmem>>, vector<2x8x8x64xf32>
    %27 = arith.select %21, %25, %26 : vector<2x8x8x64xi1>, vector<2x8x8x64xf32>
    %c0_23 = arith.constant 0 : index
    %c1_24 = arith.constant 1 : index
    %c0_25 = arith.constant 0 : index
    %c0_26 = arith.constant 0 : index
    %28 = vector.load %arg7[%c0_23, %c1_24, %c0_25, %c0_26] : memref<2x10x10x64xf32, #tpu.memory_space<vmem>>, vector<2x8x8x64xf32>
    %c0_27 = arith.constant 0 : index
    %c2_28 = arith.constant 2 : index
    %c0_29 = arith.constant 0 : index
    %c0_30 = arith.constant 0 : index
    %29 = vector.load %arg7[%c0_27, %c2_28, %c0_29, %c0_30] : memref<2x10x10x64xf32, #tpu.memory_space<vmem>>, vector<2x8x8x64xf32>
    %30 = arith.select %21, %28, %29 : vector<2x8x8x64xi1>, vector<2x8x8x64xf32>
    %c0_31 = arith.constant 0 : index
    %c0_32 = arith.constant 0 : index
    %c2_33 = arith.constant 2 : index
    %c0_34 = arith.constant 0 : index
    %31 = vector.load %arg7[%c0_31, %c0_32, %c2_33, %c0_34] : memref<2x10x10x64xf32, #tpu.memory_space<vmem>>, vector<2x8x8x64xf32>
    %c0_35 = arith.constant 0 : index
    %c1_36 = arith.constant 1 : index
    %c2_37 = arith.constant 2 : index
    %c0_38 = arith.constant 0 : index
    %32 = vector.load %arg7[%c0_35, %c1_36, %c2_37, %c0_38] : memref<2x10x10x64xf32, #tpu.memory_space<vmem>>, vector<2x8x8x64xf32>
    %33 = arith.select %21, %31, %32 : vector<2x8x8x64xi1>, vector<2x8x8x64xf32>
    %c0_39 = arith.constant 0 : index
    %c1_40 = arith.constant 1 : index
    %c2_41 = arith.constant 2 : index
    %c0_42 = arith.constant 0 : index
    %34 = vector.load %arg7[%c0_39, %c1_40, %c2_41, %c0_42] : memref<2x10x10x64xf32, #tpu.memory_space<vmem>>, vector<2x8x8x64xf32>
    %c0_43 = arith.constant 0 : index
    %c2_44 = arith.constant 2 : index
    %c2_45 = arith.constant 2 : index
    %c0_46 = arith.constant 0 : index
    %35 = vector.load %arg7[%c0_43, %c2_44, %c2_45, %c0_46] : memref<2x10x10x64xf32, #tpu.memory_space<vmem>>, vector<2x8x8x64xf32>
    %36 = arith.select %21, %34, %35 : vector<2x8x8x64xi1>, vector<2x8x8x64xf32>
    %37 = vector.shape_cast %22 : vector<2x8x8x64xf32> to vector<128x64xf32>
    %c0_47 = arith.constant 0 : index
    %c0_48 = arith.constant 0 : index
    %38 = vector.load %arg8[%c0_47, %c0_48] : memref<128x448xf32, #tpu.memory_space<vmem>>, vector<128x64xf32>
    tpu.vector_store %arg8[%c0_47, %c0_48], %37 {strides = array<i32>} : memref<128x448xf32, #tpu.memory_space<vmem>>, vector<128x64xf32>,
    %39 = vector.shape_cast %23 : vector<2x8x8x64xf32> to vector<128x64xf32>
    %c0_49 = arith.constant 0 : index
    %c64 = arith.constant 64 : index
    %40 = vector.load %arg8[%c0_49, %c64] : memref<128x448xf32, #tpu.memory_space<vmem>>, vector<128x64xf32>
    tpu.vector_store %arg8[%c0_49, %c64], %39 {strides = array<i32>} : memref<128x448xf32, #tpu.memory_space<vmem>>, vector<128x64xf32>,
    %41 = vector.shape_cast %24 : vector<2x8x8x64xf32> to vector<128x64xf32>
    %c0_50 = arith.constant 0 : index
    %c128 = arith.constant 128 : index
    %42 = vector.load %arg8[%c0_50, %c128] : memref<128x448xf32, #tpu.memory_space<vmem>>, vector<128x64xf32>
    tpu.vector_store %arg8[%c0_50, %c128], %41 {strides = array<i32>} : memref<128x448xf32, #tpu.memory_space<vmem>>, vector<128x64xf32>,
    %43 = vector.shape_cast %27 : vector<2x8x8x64xf32> to vector<128x64xf32>
    %c0_51 = arith.constant 0 : index
    %c192 = arith.constant 192 : index
    %44 = vector.load %arg8[%c0_51, %c192] : memref<128x448xf32, #tpu.memory_space<vmem>>, vector<128x64xf32>
    tpu.vector_store %arg8[%c0_51, %c192], %43 {strides = array<i32>} : memref<128x448xf32, #tpu.memory_space<vmem>>, vector<128x64xf32>,
    %45 = vector.shape_cast %30 : vector<2x8x8x64xf32> to vector<128x64xf32>
    %c0_52 = arith.constant 0 : index
    %c256 = arith.constant 256 : index
    %46 = vector.load %arg8[%c0_52, %c256] : memref<128x448xf32, #tpu.memory_space<vmem>>, vector<128x64xf32>
    tpu.vector_store %arg8[%c0_52, %c256], %45 {strides = array<i32>} : memref<128x448xf32, #tpu.memory_space<vmem>>, vector<128x64xf32>,
    %47 = vector.shape_cast %33 : vector<2x8x8x64xf32> to vector<128x64xf32>
    %c0_53 = arith.constant 0 : index
    %c320 = arith.constant 320 : index
    %48 = vector.load %arg8[%c0_53, %c320] : memref<128x448xf32, #tpu.memory_space<vmem>>, vector<128x64xf32>
    tpu.vector_store %arg8[%c0_53, %c320], %47 {strides = array<i32>} : memref<128x448xf32, #tpu.memory_space<vmem>>, vector<128x64xf32>,
    %49 = vector.shape_cast %36 : vector<2x8x8x64xf32> to vector<128x64xf32>
    %c0_54 = arith.constant 0 : index
    %c384 = arith.constant 384 : index
    %50 = vector.load %arg8[%c0_54, %c384] : memref<128x448xf32, #tpu.memory_space<vmem>>, vector<128x64xf32>
    tpu.vector_store %arg8[%c0_54, %c384], %49 {strides = array<i32>} : memref<128x448xf32, #tpu.memory_space<vmem>>, vector<128x64xf32>,
    %c0_55 = arith.constant 0 : index
    %c0_56 = arith.constant 0 : index
    %51 = vector.load %arg8[%c0_55, %c0_56] : memref<128x448xf32, #tpu.memory_space<vmem>>, vector<128x448xf32>
    %c0_57 = arith.constant 0 : index
    %c0_58 = arith.constant 0 : index
    %c0_59 = arith.constant 0 : index
    %52 = vector.load %arg2[%c0_57, %c0_58, %c0_59] : memref<1x448x64xf32, #tpu.memory_space<vmem>>, vector<1x448x64xf32>
    %53 = vector.shape_cast %52 : vector<1x448x64xf32> to vector<448x64xf32>
    %cst = arith.constant dense<0.000000e+00> : vector<128x64xf32>
    %54 = tpu.matmul %51, %53, %cst {dimension_numbers = #tpu.dot_dimension_numbers<[1], [0], [0], [1], [0, 0, 1, 1], [], []>} : vector<128x448xf32>, vector<448x64xf32>, vector<128x64xf32> -> vector<128x64xf32>
    %c0_60 = arith.constant 0 : index
    %c0_61 = arith.constant 0 : index
    %c0_62 = arith.constant 0 : index
    %55 = vector.load %arg3[%c0_60, %c0_61, %c0_62] : memref<1x1x64xf32, #tpu.memory_space<vmem>>, vector<1x1x64xf32>
    %56 = vector.shape_cast %55 : vector<1x1x64xf32> to vector<1x64xf32>
    %57 = vector.broadcast %56 : vector<1x64xf32> to vector<128x64xf32>
    %58 = arith.addf %54, %57 : vector<128x64xf32>
    %cst_63 = arith.constant 0.000000e+00 : f32
    %59 = vector.broadcast %cst_63 : f32 to vector<128x64xf32>
    %60 = arith.maximumf %58, %59 : vector<128x64xf32>
    %c7_i32 = arith.constant 7 : i32
    %61 = arith.cmpi slt, %arg0, %c7_i32 : i32
    %62 = arith.extui %61 : i1 to i32
    %c0_i32_64 = arith.constant 0 : i32
    %63 = arith.cmpi ne, %62, %c0_i32_64 : i32
    scf.if %63 {
      %67 = vector.shape_cast %60 : vector<128x64xf32> to vector<2x8x8x64xf32>
      %c0_67 = arith.constant 0 : index
      %c1_68 = arith.constant 1 : index
      %c1_69 = arith.constant 1 : index
      %c0_70 = arith.constant 0 : index
      %68 = vector.load %arg7[%c0_67, %c1_68, %c1_69, %c0_70] : memref<2x10x10x64xf32, #tpu.memory_space<vmem>>, vector<2x8x8x64xf32>
      tpu.vector_store %arg7[%c0_67, %c1_68, %c1_69, %c0_70], %67 {strides = array<i32>} : memref<2x10x10x64xf32, #tpu.memory_space<vmem>>, vector<2x8x8x64xf32>,
    } else {
    }
    %c7_i32_65 = arith.constant 7 : i32
    %64 = arith.cmpi eq, %arg0, %c7_i32_65 : i32
    %65 = arith.extui %64 : i1 to i32
    %c0_i32_66 = arith.constant 0 : i32
    %66 = arith.cmpi ne, %65, %c0_i32_66 : i32
    scf.if %66 {
      %67 = vector.shape_cast %60 : vector<128x64xf32> to vector<2x64x64xf32>
      %c0_67 = arith.constant 0 : index
      %c0_68 = arith.constant 0 : index
      %c0_69 = arith.constant 0 : index
      %68 = vector.load %arg9[%c0_67, %c0_68, %c0_69] : memref<2x64x64xf32, #tpu.memory_space<vmem>>, vector<2x64x64xf32>
      tpu.vector_store %arg9[%c0_67, %c0_68, %c0_69], %67 {strides = array<i32>} : memref<2x64x64xf32, #tpu.memory_space<vmem>>, vector<2x64x64xf32>,
      tpu.wait_dma2 semaphore(%arg11 : memref<!tpu.dma_semaphore, #tpu.memory_space<semaphore_mem>>) src(%arg4 : memref<64x64x512xf32, #tpu.memory_space<any>>) dst(%arg10 : memref<64x64x512xf32, #tpu.memory_space<vmem>>)
      %cst_70 = arith.constant 0.000000e+00 : f32
      %69 = vector.broadcast %cst_70 : f32 to vector<2x512xf32>
      %c0_i32_71 = arith.constant 0 : i32
      %c64_i32 = arith.constant 64 : i32
      %70 = arith.addi %c0_i32_71, %c64_i32 : i32
      %c1_i32_72 = arith.constant 1 : i32
      %71 = scf.for %arg12 = %c0_i32_71 to %70 step %c1_i32_72 iter_args(%arg13 = %69) -> (vector<2x512xf32>)  : i32 {
        %c0_79 = arith.constant 0 : index
        %78 = arith.index_cast %arg12 : i32 to index
        %c0_80 = arith.constant 0 : index
        %79 = vector.load %arg9[%c0_79, %78, %c0_80] : memref<2x64x64xf32, #tpu.memory_space<vmem>>, vector<2x1x64xf32>
        %80 = vector.shape_cast %79 : vector<2x1x64xf32> to vector<2x64xf32>
        %81 = arith.index_cast %arg12 : i32 to index
        %c0_81 = arith.constant 0 : index
        %c0_82 = arith.constant 0 : index
        %82 = vector.load %arg10[%81, %c0_81, %c0_82] : memref<64x64x512xf32, #tpu.memory_space<vmem>>, vector<1x64x512xf32>
        %83 = vector.shape_cast %82 : vector<1x64x512xf32> to vector<64x512xf32>
        %cst_83 = arith.constant dense<0.000000e+00> : vector<2x512xf32>
        %84 = tpu.matmul %80, %83, %cst_83 {dimension_numbers = #tpu.dot_dimension_numbers<[1], [0], [0], [1], [0, 0, 1, 1], [], []>} : vector<2x64xf32>, vector<64x512xf32>, vector<2x512xf32> -> vector<2x512xf32>
        %85 = arith.addf %arg13, %84 : vector<2x512xf32>
        scf.yield %85 : vector<2x512xf32>
      }
      %c64_i32_73 = arith.constant 64 : i32
      %c0_74 = arith.constant 0 : index
      %c0_75 = arith.constant 0 : index
      %72 = vector.load %arg5[%c0_74, %c0_75] : memref<1x512xf32, #tpu.memory_space<vmem>>, vector<1x512xf32>
      %73 = vector.broadcast %72 : vector<1x512xf32> to vector<2x512xf32>
      %74 = arith.addf %71, %73 : vector<2x512xf32>
      %cst_76 = arith.constant 0.000000e+00 : f32
      %75 = vector.broadcast %cst_76 : f32 to vector<2x512xf32>
      %76 = arith.maximumf %74, %75 : vector<2x512xf32>
      %c0_77 = arith.constant 0 : index
      %c0_78 = arith.constant 0 : index
      %77 = vector.load %arg6[%c0_77, %c0_78] : memref<2x512xf32, #tpu.memory_space<vmem>>, vector<2x512xf32>
      tpu.vector_store %arg6[%c0_77, %c0_78], %76 {strides = array<i32>} : memref<2x512xf32, #tpu.memory_space<vmem>>, vector<2x512xf32>,
    } else {
    }
    return
  }
  func.func @transform_0(%arg0: i32) -> (i32, i32, i32, i32) {
    %c0_i32 = arith.constant 0 : i32
    %c0_i32_0 = arith.constant 0 : i32
    %c0_i32_1 = arith.constant 0 : i32
    %c0_i32_2 = arith.constant 0 : i32
    %c0_i32_3 = arith.constant 0 : i32
    return %c0_i32, %c0_i32_0, %c0_i32_1, %c0_i32_2 : i32, i32, i32, i32
  }
  func.func @transform_1(%arg0: i32) -> (i32, i32, i32) {
    %c0_i32 = arith.constant 0 : i32
    %c0_i32_0 = arith.constant 0 : i32
    %c0_i32_1 = arith.constant 0 : i32
    return %arg0, %c0_i32, %c0_i32_0 : i32, i32, i32
  }
  func.func @transform_2(%arg0: i32) -> (i32, i32, i32) {
    %c0_i32 = arith.constant 0 : i32
    %c0_i32_0 = arith.constant 0 : i32
    %c0_i32_1 = arith.constant 0 : i32
    return %arg0, %c0_i32, %c0_i32_0 : i32, i32, i32
  }
  func.func @transform_4(%arg0: i32) -> (i32, i32) {
    %c0_i32 = arith.constant 0 : i32
    %c0_i32_0 = arith.constant 0 : i32
    %c0_i32_1 = arith.constant 0 : i32
    return %c0_i32, %c0_i32_0 : i32, i32
  }
  func.func @transform_5(%arg0: i32) -> (i32, i32) {
    %c0_i32 = arith.constant 0 : i32
    %c0_i32_0 = arith.constant 0 : i32
    %c0_i32_1 = arith.constant 0 : i32
    return %c0_i32, %c0_i32_0 : i32, i32
  }
}

</mosaic_0001>

<bundles_post_ra>
// kernel: forward.1
= control target key start
LH: loop header
LB: loop body
LE: loop exit
PB: predicated region body
PF: predicated region fallthrough
CT: control target
= control target key end

     0   :  { %s2932_s0 = inlined_call_operand.vmem [shape: f32[2,8,8,64], index: 0, kind: input, shape index: {}]   ;;  %s2933_s1 = inlined_call_operand.hbm [shape: f32[8,448,64], index: 1, kind: input, shape index: {}]   ;;  %s2934_s2 = inlined_call_operand.hbm [shape: f32[8,1,64], index: 2, kind: input, shape index: {}]   ;;  %s2935_s3 = inlined_call_operand.hbm [shape: f32[64,64,512], index: 3, kind: input, shape index: {}]   ;;  %s2936_s4 = inlined_call_operand.hbm [shape: f32[1,512], index: 4, kind: input, shape index: {}]   ;;  %s2937_s5 = inlined_call_operand.hbm [shape: f32[2,512], index: 5, kind: output, shape index: {}]  }
   0x1   :  { %2938 = sst [smem:[#allocation23_spill]] %s2936_s4 }
   0x2   :  { %10 = vsyncpa [#allocation8], 0 }
   0x3   :  { %12 = vsyncpa [#allocation8 + $0x1], 0 }
   0x4   :  { %13 = vsyncpa [#allocation11], 0 }
   0x5   :  { %15 = vsyncpa [#allocation11 + $0x1], 0 }
   0x6   :  { %16 = vsyncpa [#allocation9], 0  ;;  %s2075_s18 = smov 0   ;;  %s2077_s19 = smov 0  }
   0x7   :  { %s2079_s20 = smov 0   ;;  %s2081_s21 = smov 0  }
   0x8 LB: > { %s2094_s22 = sadd.s32 4294967295, %s2016_s21   ;;  %s2097_s23 = sadd.s32 1, %s2016_s21   ;;  %s2016_s21 = sphi %s2081_s21, %s2953_s21   ;;  %s2012_s20 = sphi %s2079_s20, %s2952_s20   ;;  %s2008_s19 = sphi %s2077_s19, %s2951_s19   ;;  %s2004_s18 = sphi %s2075_s18, %s2950_s18  }
   0x9   : > { %s47_s24 = ssub.s32 %s2016_s21, %s2097_s23  ;;  %s50_s25 = sadd.s32 1, %s2012_s20 }
   0xa   : > { %p48_p0 = scmp.eq.s32.totalorder %s47_s24, 0  ;;  %p57_p1 = scmp.ne.s32.totalorder %s2012_s20, %s2008_s19 }
   0xb   : > { %p58_p2 = scmp.eq.s32.totalorder %s2016_s21, 0  ;;  %p63_p3 = scmp.ne.s32.totalorder %s2008_s19, %s2004_s18 }
   0xc   : > { %s2107_s26 = scalar_select %p48_p0, %s2012_s20, %s50_s25  }
   0xd   : > { %p2109_p4 = por %p58_p2, %p57_p1  ;;  %p64_p5 = scmp.eq.s32.totalorder %s2094_s22, 0 }
   0xe   : > { %p1658_p6 = scmp.ge.s32.totalorder %s2016_s21, 1  ;;  %p142_p7 = scmp.lt.s32.totalorder %s2016_s21, 9 }
   0xf   : > { %p2118_p8 = por %p64_p5, %p63_p3  ;;  %p1659_p9 = scmp.ne.s32.totalorder %s2094_s22, 0 }
  0x10   : > { %p2123_p10 = pnand %p1658_p6, %p142_p7  ;;  %s2942_s4 = sld [smem:[#allocation23_spill]] }
  0x11   : > { %s2038_s8 = smov [#allocation12]   ;;  %p1722_p13 = scmp.lt.s32.totalorder %s2016_s21, 8 }
  0x12   : > { %p1710_p11 = pneg %p2123_p10  ;;  %s159_s9 = sshll.u32 %s2038_s8, 4  ;;  %s160_s9 = int_to_ptr.vmem [resolvable:$true] %s159_s9 }
  0x13   : > { %s2136_s10 = sand.u32 1, %s2012_s20   ;;  %s1696_s11 = smul.u32 448, %s2016_s21 }
  0x14   : > { %p1711_p12 = pnand %p1710_p11, %p64_p5  ;;  %p2141_p0 = pnand %p1722_p13, %p2109_p4 }
  0x15   : > { %s1695_s13 = smul.u32 448, %s2136_s10  ;;  %s179_s16 = scalar_lea.hbm %s2933_s1, %s1696_s11 }
  0x16   : > { %s157_s7 = sshll.u32 %s2942_s4, 4  ;;  %s180_s17 = sshll.u32 %s179_s16, 4  ;;  %s158_s7 = int_to_ptr.hbm [resolvable:$true] %s157_s7  ;;  %s181_s17 = int_to_ptr.hbm [resolvable:$true] %s180_s17 }
  0x17   : > { %1713 = dma.hbm_to_vmem [thread:$0]  (!%p1711_p12), %s158_s7, 64, %s160_s9, [#allocation11]  }
  0x18   : > { %s174_s18 = scalar_lea.vmem [#allocation7], %s1695_s13  ;;  %s192_s25 = sand.u32 1, %s2016_s21  }
  0x19   : > { %s182_s24 = sshll.u32 %s174_s18, 4  ;;  %s171_s30 = scalar_lea.sflag [#allocation8], %s2136_s10  ;;  %s183_s24 = int_to_ptr.vmem [resolvable:$true] %s182_s24 }
  0x1a   : > { %s1836_s27 = sshra.s32 %s181_s17, 4  ;;  %p1840_p2 = pneg %p2141_p0  ;;  %s1837_s27 = int_to_ptr.hbm [resolvable:$true] %s1836_s27 }
  0x1b   : > { %s1838_s6 = scalar_lea.hbm %s1837_s27, 448  ;;  %s1843_s9 = scalar_lea.hbm %s2933_s1, 3584 }
  0x1c   : > { %p1839_p1 = scmp.ne.s32.totalorder %s1837_s27, %s1838_s6  ;;  %p1844_p6 = scmp.lt.s32.totalorder %s1837_s27, %s2933_s1 }
  0x1d   : > { %p1845_p7 = scmp.lt.s32.totalorder %s1843_s9, %s1838_s6 }
  0x1e   : > { %p1841_p3 = pnand %p1840_p2, %p1839_p1 }
  0x1f   : > { %p1846_p11 = por %p1845_p7, %p1844_p6 }
  0x20   : > { %p1842_p4 = pneg %p1841_p3 }
  0x22   : > { %p1847_p12 = pnand %p1846_p11, %p1842_p4 }
  0x24   : > { %1850 = shalt.err (!%p1847_p12)
}
  0x25   : > { %s2039_s14 = smov 128   ;;  %s2040_s15 = smov 8  }
  0x26   : > { %1717 = dma.hbm_to_vmem [thread:$0]  (!%p2141_p0), %s181_s17, 7168, %s183_s24, %s171_s30, %s2039_s14, %s2039_s14, %s2040_s15  }
  0x27   : > { %s198_s7 = scalar_lea.hbm %s2934_s2, %s2016_s21  ;;  %s195_s8 = scalar_lea.vmem [#allocation10], %s2136_s10 }
  0x28   : > { %s202_s4 = sshll.u32 %s195_s8, 4  ;;  %s200_s11 = sshll.u32 %s198_s7, 4  ;;  %s203_s4 = int_to_ptr.vmem [resolvable:$true] %s202_s4  ;;  %s201_s11 = int_to_ptr.hbm [resolvable:$true] %s200_s11 }
  0x29   : > { %s193_s27 = scalar_lea.sflag [#allocation11], %s192_s25  ;;  %s1866_s6 = sshra.s32 %s201_s11, 4  ;;  %s1867_s6 = int_to_ptr.hbm [resolvable:$true] %s1866_s6 }
  0x2a   : > { %s1868_s9 = scalar_lea.hbm %s1867_s6, 1  ;;  %s1873_s24 = scalar_lea.hbm %s2934_s2, 8 }
  0x2b   : > { %p1869_p13 = scmp.ne.s32.totalorder %s1867_s6, %s1868_s9  ;;  %p1874_p4 = scmp.lt.s32.totalorder %s1867_s6, %s2934_s2 }
  0x2c   : > { %p1875_p6 = scmp.lt.s32.totalorder %s1873_s24, %s1868_s9 }
  0x2d   : > { %p1871_p1 = pnand %p1869_p13, %p1840_p2 }
  0x2e   : > { %p1876_p7 = por %p1875_p6, %p1874_p4 }
  0x2f   : > { %p1872_p3 = pneg %p1871_p1 }
  0x31   : > { %p1877_p11 = pnand %p1876_p7, %p1872_p3 }
  0x33   : > { %1880 = shalt.err (!%p1877_p11)
}
  0x34   : > { %1720 = dma.hbm_to_vmem [thread:$0]  (!%p2141_p0), %s201_s11, 16, %s203_s4, %s193_s27  }
  0x35   : > { %211 = sbr.rel (%p2123_p10) target bundleno = 728 (0x2d8), region = 36  ;;  %s2183_s10 = sand.u32 (!%p2123_p10), 1, %s2008_s19  }
  0x36   : > { %s1697_s25 = smul.u32 (!%p2123_p10), 448, %s2183_s10  ;;  %s214_s14 = scalar_lea.sflag (!%p2123_p10), [#allocation8], %s2183_s10 }
  0x38   : > { %s2187_s15 = scalar_lea.vmem (!%p2123_p10), [#allocation7], %s1697_s25 }
  0x3a   : > { %1985 = dma.done.wait (%p2118_p8), %s214_s14, 7168  }
  0x3b   : > { %1987 = vsyncadd (%p2118_p8), %s214_s14, 4294960128  ;;  %s223_s4 = sand.u32 1, %s2094_s22   ;;  %s226_s12 = scalar_lea.vmem [#allocation10], %s2183_s10 }
  0x3c   : > { %s224_s29 = scalar_lea.sflag [#allocation11], %s223_s4 }
  0x3d   : > { %1989 = dma.done.wait (%p2118_p8), %s224_s29, 16  }
  0x3e   : > { %1991 = vsyncadd (%p2118_p8), %s224_s29, 4294967280 }
  0x3f   : > { %1993 = dma.done.wait (%p64_p5), [#allocation11], 64  }
  0x40   : > { %1995 = vsyncadd (%p64_p5), [#allocation11], 4294967232  ;;  %259 = sbr.rel (%p1659_p9) target bundleno = 126 (0x7e), region = 52  ;;  %s267_s7 = sshll.u32 (!%p1659_p9), %s2935_s3, 4  ;;  %s268_s7 = int_to_ptr.hbm [resolvable:$true] %s267_s7 }
  0x41   : > { %s2042_s28 = smov (!%p1659_p9), [#allocation5]  }
  0x42   : > { %s269_s8 = sshll.u32 (!%p1659_p9), %s2042_s28, 4  ;;  %s270_s8 = int_to_ptr.vmem [resolvable:$true] %s269_s8 }
  0x43   : > { %272 = dma.hbm_to_vmem [thread:$0]  (!%p1659_p9), %s268_s7, 262144, %s270_s8, [#allocation6] }
  0x45   : > { %vm273_vm0 = vcmask 523264   ;;  %v2041_v0 = vmov 0.0   ;;  %vm275_vm1 = vcmask 517120   ;;  %v315_v1 = vld [vmem:[%s2932_s0] sm:$0xff]  ;;  %v316_v2 = vld [vmem:[%s2932_s0 + $0x8] sm:$0xff]  ;;  %v317_v3 = vld [vmem:[%s2932_s0 + $0x10] sm:$0xff] }
  0x46   : > { %277 = vst.msk [vmem:[#allocation2 + $0x10] sm:$0xff] %vm273_vm0, %v2041_v0  ;;  %v318_v4 = vld [vmem:[%s2932_s0 + $0x18] sm:$0xff]  ;;  %v319_v5 = vld [vmem:[%s2932_s0 + $0x20] sm:$0xff]  ;;  %v320_v6 = vld [vmem:[%s2932_s0 + $0x28] sm:$0xff] }
  0x47   : > { %274 = vst.msk [vmem:[#allocation2] sm:$0xff] %vm273_vm0, %v2041_v0  ;;  %v321_v7 = vld [vmem:[%s2932_s0 + $0x30] sm:$0xff]  ;;  %v322_v8 = vld [vmem:[%s2932_s0 + $0x38] sm:$0xff]  ;;  %v323_v9 = vld [vmem:[%s2932_s0 + $0x40] sm:$0xff] }
  0x48   : > { %279 = vst.msk [vmem:[#allocation2 + $0x20] sm:$0xff] %vm273_vm0, %v2041_v0  ;;  %v324_v10 = vld [vmem:[%s2932_s0 + $0x48] sm:$0xff]  ;;  %v325_v11 = vld [vmem:[%s2932_s0 + $0x50] sm:$0xff]  ;;  %v326_v12 = vld [vmem:[%s2932_s0 + $0x58] sm:$0xff] }
  0x49   : > { %281 = vst.msk [vmem:[#allocation2 + $0x30] sm:$0xff] %vm273_vm0, %v2041_v0  ;;  %v327_v13 = vld [vmem:[%s2932_s0 + $0x60] sm:$0xff]  ;;  %v328_v14 = vld [vmem:[%s2932_s0 + $0x68] sm:$0xff]  ;;  %v329_v15 = vld [vmem:[%s2932_s0 + $0x70] sm:$0xff] }
  0x4a   : > { %283 = vst.msk [vmem:[#allocation2 + $0x40] sm:$0xff] %vm273_vm0, %v2041_v0  ;;  %v330_v16 = vld [vmem:[%s2932_s0 + $0x78] sm:$0xff] }
  0x4b   : > { %285 = vst.msk [vmem:[#allocation2 + $0x50] sm:$0xff] %vm273_vm0, %v2041_v0 }
  0x4c   : > { %287 = vst.msk [vmem:[#allocation2 + $0x60] sm:$0xff] %vm273_vm0, %v2041_v0 }
  0x4d   : > { %289 = vst.msk [vmem:[#allocation2 + $0x70] sm:$0xff] %vm273_vm0, %v2041_v0 }
  0x4e   : > { %291 = vst.msk [vmem:[#allocation2 + $0x80] sm:$0xff] %vm273_vm0, %v2041_v0 }
  0x4f   : > { %293 = vst.msk [vmem:[#allocation2 + $0x90] sm:$0xff] %vm273_vm0, %v2041_v0 }
  0x50   : > { %295 = vst.msk [vmem:[#allocation2 + $0xa0] sm:$0xff] %vm273_vm0, %v2041_v0 }
  0x51   : > { %297 = vst.msk [vmem:[#allocation2 + $0xb0] sm:$0xff] %vm273_vm0, %v2041_v0 }
  0x52   : > { %299 = vst.msk [vmem:[#allocation2 + $0xc0] sm:$0xff] %vm273_vm0, %v2041_v0 }
  0x53   : > { %301 = vst.msk [vmem:[#allocation2 + $0xd0] sm:$0xff] %vm273_vm0, %v2041_v0 }
  0x54   : > { %303 = vst.msk [vmem:[#allocation2 + $0xe0] sm:$0xff] %vm273_vm0, %v2041_v0 }
  0x55   : > { %305 = vst.msk [vmem:[#allocation2 + $0xf0] sm:$0xff] %vm273_vm0, %v2041_v0 }
  0x56   : > { %307 = vst.msk [vmem:[#allocation2 + $0x100] sm:$0xff] %vm273_vm0, %v2041_v0 }
  0x57   : > { %309 = vst.msk [vmem:[#allocation2 + $0x110] sm:$0xff] %vm273_vm0, %v2041_v0 }
  0x58   : > { %311 = vst.msk [vmem:[#allocation2 + $0x120] sm:$0xff] %vm273_vm0, %v2041_v0 }
  0x59   : > { %313 = vst.msk [vmem:[#allocation2 + $0x130] sm:$0xff] %vm273_vm0, %v2041_v0 }
  0x5a   : > { %278 = vst.msk [vmem:[#allocation2 + $0x18] sm:$0x3] %vm275_vm1, %v2041_v0 }
  0x5b   : > { %276 = vst.msk [vmem:[#allocation2 + $0x8] sm:$0x3] %vm275_vm1, %v2041_v0 }
  0x5c   : > { %280 = vst.msk [vmem:[#allocation2 + $0x28] sm:$0x3] %vm275_vm1, %v2041_v0 }
  0x5d   : > { %282 = vst.msk [vmem:[#allocation2 + $0x38] sm:$0x3] %vm275_vm1, %v2041_v0 }
  0x5e   : > { %284 = vst.msk [vmem:[#allocation2 + $0x48] sm:$0x3] %vm275_vm1, %v2041_v0 }
  0x5f   : > { %286 = vst.msk [vmem:[#allocation2 + $0x58] sm:$0x3] %vm275_vm1, %v2041_v0 }
  0x60   : > { %288 = vst.msk [vmem:[#allocation2 + $0x68] sm:$0x3] %vm275_vm1, %v2041_v0 }
  0x61   : > { %290 = vst.msk [vmem:[#allocation2 + $0x78] sm:$0x3] %vm275_vm1, %v2041_v0 }
  0x62   : > { %292 = vst.msk [vmem:[#allocation2 + $0x88] sm:$0x3] %vm275_vm1, %v2041_v0 }
  0x63   : > { %294 = vst.msk [vmem:[#allocation2 + $0x98] sm:$0x3] %vm275_vm1, %v2041_v0 }
  0x64   : > { %296 = vst.msk [vmem:[#allocation2 + $0xa8] sm:$0x3] %vm275_vm1, %v2041_v0 }
  0x65   : > { %298 = vst.msk [vmem:[#allocation2 + $0xb8] sm:$0x3] %vm275_vm1, %v2041_v0 }
  0x66   : > { %300 = vst.msk [vmem:[#allocation2 + $0xc8] sm:$0x3] %vm275_vm1, %v2041_v0 }
  0x67   : > { %302 = vst.msk [vmem:[#allocation2 + $0xd8] sm:$0x3] %vm275_vm1, %v2041_v0 }
  0x68   : > { %304 = vst.msk [vmem:[#allocation2 + $0xe8] sm:$0x3] %vm275_vm1, %v2041_v0 }
  0x69   : > { %306 = vst.msk [vmem:[#allocation2 + $0xf8] sm:$0x3] %vm275_vm1, %v2041_v0 }
  0x6a   : > { %308 = vst.msk [vmem:[#allocation2 + $0x108] sm:$0x3] %vm275_vm1, %v2041_v0 }
  0x6b   : > { %310 = vst.msk [vmem:[#allocation2 + $0x118] sm:$0x3] %vm275_vm1, %v2041_v0 }
  0x6c   : > { %312 = vst.msk [vmem:[#allocation2 + $0x128] sm:$0x3] %vm275_vm1, %v2041_v0 }
  0x6d   : > { %314 = vst.msk [vmem:[#allocation2 + $0x138] sm:$0x3] %vm275_vm1, %v2041_v0 }
  0x6e   : > { %332 = vst.msk [vmem:[#allocation2 + $0x11] sm:$0xff] %vm273_vm0, %v315_v1 }
  0x6f   : > { %333 = vst.msk [vmem:[#allocation2 + $0x21] sm:$0xff] %vm273_vm0, %v316_v2 }
  0x70   : > { %334 = vst.msk [vmem:[#allocation2 + $0x31] sm:$0xff] %vm273_vm0, %v317_v3 }
  0x71   : > { %335 = vst.msk [vmem:[#allocation2 + $0x41] sm:$0xff] %vm273_vm0, %v318_v4 }
  0x72   : > { %336 = vst.msk [vmem:[#allocation2 + $0x51] sm:$0xff] %vm273_vm0, %v319_v5 }
  0x73   : > { %337 = vst.msk [vmem:[#allocation2 + $0x61] sm:$0xff] %vm273_vm0, %v320_v6 }
  0x74   : > { %338 = vst.msk [vmem:[#allocation2 + $0x71] sm:$0xff] %vm273_vm0, %v321_v7 }
  0x75   : > { %339 = vst.msk [vmem:[#allocation2 + $0x81] sm:$0xff] %vm273_vm0, %v322_v8 }
  0x76   : > { %340 = vst.msk [vmem:[#allocation2 + $0xb1] sm:$0xff] %vm273_vm0, %v323_v9 }
  0x77   : > { %341 = vst.msk [vmem:[#allocation2 + $0xc1] sm:$0xff] %vm273_vm0, %v324_v10 }
  0x78   : > { %342 = vst.msk [vmem:[#allocation2 + $0xd1] sm:$0xff] %vm273_vm0, %v325_v11 }
  0x79   : > { %343 = vst.msk [vmem:[#allocation2 + $0xe1] sm:$0xff] %vm273_vm0, %v326_v12 }
  0x7a   : > { %344 = vst.msk [vmem:[#allocation2 + $0xf1] sm:$0xff] %vm273_vm0, %v327_v13 }
  0x7b   : > { %345 = vst.msk [vmem:[#allocation2 + $0x101] sm:$0xff] %vm273_vm0, %v328_v14 }
  0x7c   : > { %346 = vst.msk [vmem:[#allocation2 + $0x111] sm:$0xff] %vm273_vm0, %v329_v15 }
  0x7d   : > { %347 = vst.msk [vmem:[#allocation2 + $0x121] sm:$0xff] %vm273_vm0, %v330_v16 }
  0x7e PF: > { %v348_v17 = vlaneseq  ;;  %v493_v19 = vld [vmem:[#allocation2 + $0x2] sm:$0xff]  ;;  %vm573_vm2 = vcmask 523264   ;;  %v509_v21 = vld [vmem:[#allocation2 + $0x12] sm:$0xff]  ;;  %s2043_s18 = smov 64   ;;  %vm654_vm4 = vcmask 1048064   ;;  %p1681_p5 = scmp.ge.s32.totalorder %s2094_s22, 7 }
  0x7f   : > { %v382_v20 = vld [vmem:[#allocation2 + $0x21] sm:$0xff]  ;;  %v381_v23 = vld [vmem:[#allocation2 + $0x11] sm:$0xff] }
  0x80   : > { %v349_v18 = vshrl.u32 %v348_v17, 7  ;;  %v541_v22 = vld [vmem:[#allocation2 + $0x22] sm:$0xff]  ;;  %671 = vst.msk [vmem:[#allocation3 + $0x8] sm:$0xff] %vm573_vm2, %v382_v20  ;;  %v429_v26 = vld [vmem:[#allocation2 + $0x10] sm:$0xff]  ;;  %608 = vrot.lane.b32.xlu2 %v381_v23, %s2043_s18  ;;  %v990_v9 = vld [vmem:[%s2187_s15 + $0x178] sm:$0xff] }
  0x81   : > { %v413_v25 = vld [vmem:[#allocation2] sm:$0xff]  ;;  %574 = vst.msk [vmem:[#allocation3] sm:$0xff] %vm573_vm2, %v381_v23  ;;  %v542_v27 = vld [vmem:[#allocation2 + $0x32] sm:$0xff]  ;;  %1181 = vmatpush.msra.mxu2 %v990_v9  ;;  %v988_v15 = vld [vmem:[%s2187_s15 + $0x168] sm:$0xff] }
  0x82   : > { %v354_v24 = vand.u32 1, %v349_v18  ;;  %v383_v28 = vld [vmem:[#allocation2 + $0x31] sm:$0xff]  ;;  %575 = vst.msk [vmem:[#allocation3 + $0x20] sm:$0xff] %vm573_vm2, %v382_v20  ;;  %v543_v30 = vld [vmem:[#allocation2 + $0x42] sm:$0xff] }
  0x83   : > { %672 = vst.msk [vmem:[#allocation3 + $0x28] sm:$0xff] %vm573_vm2, %v383_v28  ;;  %v544_v34 = vld [vmem:[#allocation2 + $0x52] sm:$0xff]  ;;  %v545_v36 = vld [vmem:[#allocation2 + $0x62] sm:$0xff] }
  0x84   : > { %vm2316_vm3 = vcmp.eq.s32.totalorder %v354_v24, 0  ;;  %576 = vst.msk [vmem:[#allocation3 + $0x40] sm:$0xff] %vm573_vm2, %v383_v28  ;;  %v430_v37 = vld [vmem:[#allocation2 + $0x20] sm:$0xff]  ;;  %v546_v40 = vld [vmem:[#allocation2 + $0x72] sm:$0xff]  ;;  %v976_v9 = vld [vmem:[%s2187_s15 + $0x108] sm:$0xff] }
  0x85   : > { %v525_v31 = vsel %vm2316_vm3, %v493_v19, %v509_v21  ;;  %v557_v32 = vsel %vm2316_vm3, %v509_v21, %v541_v22  ;;  %v445_v33 = vsel %vm2316_vm3, %v413_v25, %v429_v26  ;;  %v558_v35 = vsel %vm2316_vm3, %v541_v22, %v542_v27  ;;  %v380_v44 = vld [vmem:[#allocation2 + $0x1] sm:$0xff]  ;;  %v385_v46 = vld [vmem:[#allocation2 + $0x51] sm:$0xff] }
  0x86   : > { %863 = vst.msk [vmem:[#allocation3 + $0x18] sm:$0xff] %vm573_vm2, %v557_v32  ;;  %799 = vrot.lane.b32.xlu0 %v525_v31, %s2043_s18  ;;  %703 = vrot.lane.b32.xlu1 %v445_v33, %s2043_s18  ;;  %v559_v38 = vsel %vm2316_vm3, %v542_v27, %v543_v30  ;;  %v446_v39 = vsel %vm2316_vm3, %v429_v26, %v430_v37  ;;  %v384_v45 = vld [vmem:[#allocation2 + $0x41] sm:$0xff]  ;;  %v431_v47 = vld [vmem:[#allocation2 + $0x30] sm:$0xff]  ;;  %v974_v17 = vld [vmem:[%s2187_s15 + $0xf8] sm:$0xff] }
  0x87   : > { %864 = vst.msk [vmem:[#allocation3 + $0x38] sm:$0xff] %vm573_vm2, %v558_v35  ;;  %v560_v41 = vsel %vm2316_vm3, %v543_v30, %v544_v34  ;;  %v561_v42 = vsel %vm2316_vm3, %v544_v34, %v545_v36  ;;  %v2348_v43 = vsel %vm2316_vm3, %v545_v36, %v546_v40  ;;  %v547_v48 = vld [vmem:[#allocation2 + $0x82] sm:$0xff]  ;;  %v447_v49 = vsel %vm2316_vm3, %v430_v37, %v431_v47  ;;  %v548_v53 = vld [vmem:[#allocation2 + $0x92] sm:$0xff] }
  0x88   : > { %865 = vst.msk [vmem:[#allocation3 + $0x58] sm:$0xff] %vm573_vm2, %v559_v38  ;;  %705 = vrot.lane.b32.xlu2 %v446_v39, %s2043_s18  ;;  %v2361_v50 = vsel %vm2316_vm3, %v546_v40, %v547_v48  ;;  %v386_v51 = vld [vmem:[#allocation2 + $0x61] sm:$0xff]  ;;  %v564_v55 = vsel %vm2316_vm3, %v547_v48, %v548_v53  ;;  %v387_v56 = vld [vmem:[#allocation2 + $0x71] sm:$0xff]  ;;  %1116 = vmatpush.msra.mxu1 %v974_v17 }
  0x89   : > { %866 = vst.msk [vmem:[#allocation3 + $0x78] sm:$0xff] %vm573_vm2, %v560_v41  ;;  %v432_v52 = vld [vmem:[#allocation2 + $0x40] sm:$0xff]  ;;  %v433_v57 = vld [vmem:[#allocation2 + $0x50] sm:$0xff]  ;;  %v958_v22 = vld [vmem:[%s2187_s15 + $0x78] sm:$0xff] }
  0x8a   : > { %867 = vst.msk [vmem:[#allocation3 + $0x98] sm:$0xff] %vm573_vm2, %v561_v42  ;;  %v448_v54 = vsel %vm2316_vm3, %v431_v47, %v432_v52  ;;  %v449_v58 = vsel %vm2316_vm3, %v432_v52, %v433_v57  ;;  %v2384_v59 = vld [vmem:[#allocation2 + $0xb2] sm:$0xff]  ;;  %v549_v60 = vld [vmem:[#allocation2 + $0xc2] sm:$0xff]  ;;  %1051 = vmatpush.msra.mxu0 %v958_v22 }
  0x8b   : > { %868 = vst.msk [vmem:[#allocation3 + $0xb8] sm:$0xff] %vm573_vm2, %v2348_v43  ;;  %v2390_v61 = vsel %vm2316_vm3, %v2384_v59, %v549_v60  ;;  %v434_v62 = vld [vmem:[#allocation2 + $0x60] sm:$0xff]  ;;  %v550_v63 = vld [vmem:[#allocation2 + $0xd2] sm:$0xff]  ;;  %v972_v26 = vld [vmem:[%s2187_s15 + $0xe8] sm:$0xff] }
  0x8c   : > { %767 = vst.msk [vmem:[#allocation3 + $0x10] sm:$0xff] %vm573_vm2, %v446_v39  ;;  %v450_v0 = vsel %vm2316_vm3, %v433_v57, %v434_v62  ;;  %v2403_v1 = vsel %vm2316_vm3, %v549_v60, %v550_v63  ;;  %v2411_v2 = vld [vmem:[#allocation2 + $0xb1] sm:$0xff]  ;;  %v551_v4 = vld [vmem:[#allocation2 + $0xe2] sm:$0xff] }
  0x8d   : > { %673 = vst.msk [vmem:[#allocation3 + $0x48] sm:$0xff] %vm573_vm2, %v384_v45  ;;  %v435_v3 = vld [vmem:[#allocation2 + $0x70] sm:$0xff]  ;;  %v2417_v6 = vsel %vm2316_vm3, %v550_v63, %v551_v4  ;;  %v2428_v7 = vld [vmem:[#allocation2 + $0xc1] sm:$0xff]  ;;  %v986_v24 = vld [vmem:[%s2187_s15 + $0x158] sm:$0xff] }
  0x8e   : > { %606 = vrot.lane.b32.xlu0 %v380_v44, %s2043_s18  ;;  %801 = vrot.lane.b32.xlu1 %v557_v32, %s2043_s18  ;;  %577 = vst.msk [vmem:[#allocation3 + $0x60] sm:$0xff] %vm573_vm2, %v384_v45  ;;  %v451_v5 = vsel %vm2316_vm3, %v434_v62, %v435_v3  ;;  %v2430_v8 = vld [vmem:[#allocation2 + $0x80] sm:$0xff]  ;;  %v989_v11 = vld [vmem:[%s2187_s15 + $0x170] sm:$0xff]  ;;  %v956_v33 = vld [vmem:[%s2187_s15 + $0x68] sm:$0xff] }
  0x8f   : > { %674 = vst.msk [vmem:[#allocation3 + $0x68] sm:$0xff] %vm573_vm2, %v385_v46  ;;  %v452_v10 = vsel %vm2316_vm3, %v435_v3, %v2430_v8  ;;  %v552_v12 = vld [vmem:[#allocation2 + $0xf2] sm:$0xff]  ;;  %1182 = vmatpush.msra.mxu2 %v989_v11  ;;  %v501_v14 = vld [vmem:[#allocation2 + $0xa2] sm:$0xff] }
  0x90   : > { %869 = vst.msk [vmem:[#allocation3 + $0xd8] sm:$0xff] %vm573_vm2, %v2361_v50  ;;  %707 = vrot.lane.b32.xlu2 %v447_v49, %s2043_s18  ;;  %v2441_v13 = vsel %vm2316_vm3, %v551_v4, %v552_v12  ;;  %v2453_v16 = vld [vmem:[#allocation2 + $0xd1] sm:$0xff]  ;;  %v987_v18 = vld [vmem:[%s2187_s15 + $0x160] sm:$0xff]  ;;  %v533_v30 = vsel %vm2316_vm3, %v501_v14, %v2384_v59  ;;  %v984_v36 = vld [vmem:[%s2187_s15 + $0x148] sm:$0xff] }
  0x91   : > { %768 = vst.msk [vmem:[#allocation3 + $0x30] sm:$0xff] %vm573_vm2, %v447_v49  ;;  %1183 = vmatpush.msra.mxu2 %v988_v15  ;;  %v421_v19 = vld [vmem:[#allocation2 + $0xa0] sm:$0xff]  ;;  %v973_v23 = vld [vmem:[%s2187_s15 + $0xf0] sm:$0xff]  ;;  %v982_v44 = vld [vmem:[%s2187_s15 + $0x138] sm:$0xff] }
  0x92   : > { %578 = vst.msk [vmem:[#allocation3 + $0x80] sm:$0xff] %vm573_vm2, %v385_v46  ;;  %v957_v25 = vld [vmem:[%s2187_s15 + $0x70] sm:$0xff]  ;;  %1117 = vmatpush.msra.mxu1 %v973_v23  ;;  %v388_v31 = vld [vmem:[#allocation2 + $0xa1] sm:$0xff]  ;;  %v950_v59 = vld [vmem:[%s2187_s15 + $0x38] sm:$0xff] }
  0x93   : > { %675 = vst.msk [vmem:[#allocation3 + $0x88] sm:$0xff] %vm573_vm2, %v386_v51  ;;  %1184 = vmatpush.msra.mxu2 %v987_v18  ;;  %v985_v27 = vld [vmem:[%s2187_s15 + $0x150] sm:$0xff]  ;;  %1052 = vmatpush.msra.mxu0 %v957_v25  ;;  %v971_v34 = vld [vmem:[%s2187_s15 + $0xe0] sm:$0xff]  ;;  %v980_v53 = vld [vmem:[%s2187_s15 + $0x128] sm:$0xff] }
  0x94   : > { %870 = vst.msk [vmem:[#allocation3 + $0xf8] sm:$0xff] %vm573_vm2, %v564_v55  ;;  %1118 = vmatpush.msra.mxu1 %v972_v26  ;;  %v955_v37 = vld [vmem:[%s2187_s15 + $0x60] sm:$0xff]  ;;  %v554_v47 = vld [vmem:[#allocation2 + $0x112] sm:$0xff] }
  0x95   : > { %769 = vst.msk [vmem:[#allocation3 + $0x50] sm:$0xff] %vm573_vm2, %v448_v54  ;;  %1185 = vmatpush.msra.mxu2 %v986_v24  ;;  %1053 = vmatpush.msra.mxu0 %v956_v33  ;;  %v983_v39 = vld [vmem:[%s2187_s15 + $0x140] sm:$0xff]  ;;  %v981_v49 = vld [vmem:[%s2187_s15 + $0x130] sm:$0xff]  ;;  %v966_v55 = vld [vmem:[%s2187_s15 + $0xb8] sm:$0xff] }
  0x96   : > { %803 = vrot.lane.b32.xlu0 %v558_v35, %s2043_s18  ;;  %610 = vrot.lane.b32.xlu1 %v382_v20, %s2043_s18  ;;  %579 = vst.msk [vmem:[#allocation3 + $0xa0] sm:$0xff] %vm573_vm2, %v386_v51  ;;  %v437_v20 = vld [vmem:[#allocation2 + $0xb0] sm:$0xff]  ;;  %v2483_v35 = vld [vmem:[#allocation2 + $0xe1] sm:$0xff]  ;;  %v998_v62 = vld [vmem:[%s2187_s15 + $0x1b8] sm:$0xff] }
  0x97   : > { %676 = vst.msk [vmem:[#allocation3 + $0xa8] sm:$0xff] %vm573_vm2, %v387_v56  ;;  %v453_v21 = vsel %vm2316_vm3, %v421_v19, %v437_v20  ;;  %1186 = vmatpush.msra.mxu2 %v985_v27  ;;  %1119 = vmatpush.msra.mxu1 %v971_v34  ;;  %v438_v40 = vld [vmem:[#allocation2 + $0xc0] sm:$0xff]  ;;  %v2515_v52 = vld [vmem:[#allocation2 + $0xf1] sm:$0xff]  ;;  %v960_v24 = vld [vmem:[%s2187_s15 + $0x88] sm:$0xff] }
  0x98   : > { %709 = vrot.lane.b32.xlu2 %v448_v54, %s2043_s18  ;;  %770 = vst.msk [vmem:[#allocation3 + $0x70] sm:$0xff] %vm573_vm2, %v449_v58  ;;  %1054 = vmatpush.msra.mxu0 %v955_v37  ;;  %v951_v54 = vld [vmem:[%s2187_s15 + $0x40] sm:$0xff]  ;;  %v439_v57 = vld [vmem:[#allocation2 + $0xd0] sm:$0xff]  ;;  %v962_v14 = vld [vmem:[%s2187_s15 + $0x98] sm:$0xff] }
  0x99   : > { %871 = vst.msk [vmem:[#allocation3 + $0x118] sm:$0xff] %vm573_vm2, %v2390_v61  ;;  %1187 = vmatpush.msra.mxu2 %v984_v36  ;;  %v965_v60 = vld [vmem:[%s2187_s15 + $0xb0] sm:$0xff]  ;;  %1254 = vmatpush.msra.mxu3 %v998_v62  ;;  %v555_v3 = vld [vmem:[#allocation2 + $0x122] sm:$0xff] }
  0x9a   : > { %580 = vst.msk [vmem:[#allocation3 + $0xc0] sm:$0xff] %vm573_vm2, %v387_v56  ;;  %v949_v63 = vld [vmem:[%s2187_s15 + $0x30] sm:$0xff]  ;;  %v2543_v4 = vsel %vm2316_vm3, %v554_v47, %v555_v3  ;;  %v2551_v11 = vld [vmem:[#allocation2 + $0x101] sm:$0xff] }
  0x9b   : > { %872 = vst.msk [vmem:[#allocation3 + $0x138] sm:$0xff] %vm573_vm2, %v2403_v1  ;;  %1188 = vmatpush.msra.mxu2 %v983_v39  ;;  %v440_v15 = vld [vmem:[#allocation2 + $0xe0] sm:$0xff]  ;;  %v961_v19 = vld [vmem:[%s2187_s15 + $0x90] sm:$0xff]  ;;  %v944_v27 = vld [vmem:[%s2187_s15 + $0x8] sm:$0xff] }
  0x9c   : > { %771 = vst.msk [vmem:[#allocation3 + $0x90] sm:$0xff] %vm573_vm2, %v450_v0  ;;  %v975_v17 = vld [vmem:[%s2187_s15 + $0x100] sm:$0xff]  ;;  %v945_v22 = vld [vmem:[%s2187_s15 + $0x10] sm:$0xff]  ;;  %v992_v33 = vld [vmem:[%s2187_s15 + $0x188] sm:$0xff] }
  0x9d   : > { %582 = vst.msk [vmem:[#allocation3 + $0x100] sm:$0xff] %vm573_vm2, %v2411_v2  ;;  %1189 = vmatpush.msra.mxu2 %v982_v44  ;;  %v995_v18 = vld [vmem:[%s2187_s15 + $0x1a0] sm:$0xff]  ;;  %v556_v23 = vld [vmem:[#allocation2 + $0x132] sm:$0xff] }
  0x9e   : > { %805 = vrot.lane.b32.xlu0 %v559_v38, %s2043_s18  ;;  %612 = vrot.lane.b32.xlu1 %v383_v28, %s2043_s18  ;;  %873 = vst.msk [vmem:[#allocation3 + $0x158] sm:$0xff] %vm573_vm2, %v2417_v6  ;;  %v553_v28 = vld [vmem:[#allocation2 + $0x102] sm:$0xff]  ;;  %v970_v38 = vld [vmem:[%s2187_s15 + $0xd8] sm:$0xff]  ;;  %v993_v25 = vld [vmem:[%s2187_s15 + $0x190] sm:$0xff]  ;;  %v572_v26 = vsel %vm2316_vm3, %v555_v3, %v556_v23 }
  0x9f   : > { %772 = vst.msk [vmem:[#allocation3 + $0xb0] sm:$0xff] %vm573_vm2, %v451_v5  ;;  %v2475_v32 = vsel %vm2316_vm3, %v552_v12, %v553_v28  ;;  %1120 = vmatpush.msra.mxu1 %v970_v38  ;;  %v2504_v48 = vsel %vm2316_vm3, %v553_v28, %v554_v47  ;;  %1190 = vmatpush.msra.mxu2 %v981_v49  ;;  %v947_v12 = vld [vmem:[%s2187_s15 + $0x20] sm:$0xff]  ;;  %v395_v28 = vld [vmem:[#allocation2 + $0x111] sm:$0xff] }
  0xa0   : > { %711 = vrot.lane.b32.xlu2 %v449_v58, %s2043_s18  ;;  %679 = vst.msk [vmem:[#allocation3 + $0x108] sm:$0xff] %vm573_vm2, %v2428_v7  ;;  %v455_v58 = vsel %vm2316_vm3, %v438_v40, %v439_v57  ;;  %v943_v36 = vld [vmem:[%s2187_s15] sm:$0xff]  ;;  %v902_v3 = vld [vmem:[#allocation3 + $0xb8] sm:$0xff] }
  0xa1   : > { %773 = vst.msk [vmem:[#allocation3 + $0xd0] sm:$0xff] %vm573_vm2, %v452_v10  ;;  %1191 = vmatpush.msra.mxu2 %v980_v53  ;;  %v991_v37 = vld [vmem:[%s2187_s15 + $0x180] sm:$0xff]  ;;  %v894_v53 = vld [vmem:[#allocation3 + $0x78] sm:$0xff] }
  0xa2   : > { %874 = vst.msk [vmem:[#allocation3 + $0x178] sm:$0xff] %vm573_vm2, %v2441_v13  ;;  %v442_v38 = vld [vmem:[#allocation2 + $0x100] sm:$0xff] }
  0xa3   : > { %583 = vst.msk [vmem:[#allocation3 + $0x120] sm:$0xff] %vm573_vm2, %v2428_v7  ;;  %v2615_v47 = vld [vmem:[#allocation2 + $0x120] sm:$0xff] }
  0xa4   : > { %680 = vst.msk [vmem:[#allocation3 + $0x128] sm:$0xff] %vm573_vm2, %v2453_v16 }
  0xa5   : > { %584 = vst.msk [vmem:[#allocation3 + $0x140] sm:$0xff] %vm573_vm2, %v2453_v16 }
  0xa6   : > { %807 = vrot.lane.b32.xlu0 %v560_v41, %s2043_s18  ;;  %614 = vrot.lane.b32.xlu1 %v384_v45, %s2043_s18  ;;  %875 = vst.msk [vmem:[#allocation3 + $0x198] sm:$0xff] %vm573_vm2, %v2475_v32  ;;  %v954_v41 = vld [vmem:[%s2187_s15 + $0x58] sm:$0xff]  ;;  %v953_v45 = vld [vmem:[%s2187_s15 + $0x50] sm:$0xff] }
  0xa7   : > { %681 = vst.msk [vmem:[#allocation3 + $0x148] sm:$0xff] %vm573_vm2, %v2483_v35  ;;  %1055 = vmatpush.msra.mxu0 %v954_v41 }
  0xa8   : > { %713 = vrot.lane.b32.xlu2 %v450_v0, %s2043_s18  ;;  %585 = vst.msk [vmem:[#allocation3 + $0x160] sm:$0xff] %vm573_vm2, %v2483_v35  ;;  %v964_v0 = vld [vmem:[%s2187_s15 + $0xa8] sm:$0xff] }
  0xa9   : > { %876 = vst.msk [vmem:[#allocation3 + $0x1b8] sm:$0xff] %vm573_vm2, %v2504_v48  ;;  %1056 = vmatpush.msra.mxu0 %v953_v45  ;;  %v890_v45 = vld [vmem:[#allocation3 + $0x58] sm:$0xff] }
  0xaa   : > { %682 = vst.msk [vmem:[#allocation3 + $0x168] sm:$0xff] %vm573_vm2, %v2515_v52 }
  0xab   : > { %586 = vst.msk [vmem:[#allocation3 + $0x180] sm:$0xff] %vm573_vm2, %v2515_v52 }
  0xac   : > { %776 = vst.msk [vmem:[#allocation3 + $0x130] sm:$0xff] %vm573_vm2, %v455_v58 }
  0xad   : > { %877 = vst.msk [vmem:[#allocation3 + $0x1d8] sm:$0xff] %vm573_vm2, %v2543_v4 }
  0xae   : > { %809 = vrot.lane.b32.xlu0 %v561_v42, %s2043_s18  ;;  %616 = vrot.lane.b32.xlu1 %v385_v46, %s2043_s18  ;;  %v454_v42 = vsel %vm2316_vm3, %v437_v20, %v438_v40  ;;  %v968_v46 = vld [vmem:[%s2187_s15 + $0xc8] sm:$0xff]  ;;  %683 = vst.msk [vmem:[#allocation3 + $0x188] sm:$0xff] %vm573_vm2, %v2551_v11  ;;  %v994_v20 = vld [vmem:[%s2187_s15 + $0x198] sm:$0xff] }
  0xaf   : > { %775 = vst.msk [vmem:[#allocation3 + $0x110] sm:$0xff] %vm573_vm2, %v454_v42  ;;  %v886_v40 = vld [vmem:[#allocation3 + $0x38] sm:$0xff] }
  0xb0   : > { %715 = vrot.lane.b32.xlu2 %v451_v5, %s2043_s18  ;;  %v948_v5 = vld [vmem:[%s2187_s15 + $0x28] sm:$0xff]  ;;  %587 = vst.msk [vmem:[#allocation3 + $0x1a0] sm:$0xff] %vm573_vm2, %v2551_v11 }
  0xb1   : > { %878 = vst.msk [vmem:[#allocation3 + $0x1f8] sm:$0xff] %vm573_vm2, %v572_v26 }
  0xb2   : > { %684 = vst.msk [vmem:[#allocation3 + $0x1a8] sm:$0xff] %vm573_vm2, %v395_v28 }
  0xb3   : > { %588 = vst.msk [vmem:[#allocation3 + $0x1c0] sm:$0xff] %vm573_vm2, %v395_v28 }
  0xb4   : > { %v938_v29 = vld [vmem:[#allocation3 + $0x1d8] sm:$0xff] }
  0xb6   : > { %811 = vrot.lane.b32.xlu0 %v2348_v43, %s2043_s18  ;;  %618 = vrot.lane.b32.xlu1 %v386_v51, %s2043_s18  ;;  %v969_v43 = vld [vmem:[%s2187_s15 + $0xd0] sm:$0xff]  ;;  %v967_v51 = vld [vmem:[%s2187_s15 + $0xc0] sm:$0xff] }
  0xb7   : > { %1121 = vmatpush.msra.mxu1 %v969_v43 }
  0xb8   : > { %717 = vrot.lane.b32.xlu2 %v452_v10, %s2043_s18  ;;  %v996_v10 = vld [vmem:[%s2187_s15 + $0x1a8] sm:$0xff] }
  0xb9   : > { %1122 = vmatpush.msra.mxu1 %v968_v46 }
  0xbb   : > { %1123 = vmatpush.msra.mxu1 %v967_v51 }
  0xbd   : > { %1124 = vmatpush.msra.mxu1 %v966_v55 }
  0xbe   : > { %813 = vrot.lane.b32.xlu0 %v2361_v50, %s2043_s18  ;;  %620 = vrot.lane.b32.xlu1 %v387_v56, %s2043_s18  ;;  %v952_v50 = vld [vmem:[%s2187_s15 + $0x48] sm:$0xff]  ;;  %v979_v56 = vld [vmem:[%s2187_s15 + $0x120] sm:$0xff] }
  0xbf   : > { %1057 = vmatpush.msra.mxu0 %v952_v50  ;;  %1192 = vmatpush.msra.mxu2 %v979_v56 }
  0xc0   : > { %719 = vrot.lane.b32.xlu2 %v453_v21, %s2043_s18  ;;  %1125 = vmatpush.msra.mxu1 %v965_v60  ;;  %v898_v60 = vld [vmem:[#allocation3 + $0x98] sm:$0xff] }
  0xc1   : > { %1058 = vmatpush.msra.mxu0 %v951_v54 }
  0xc2   : > { %1126 = vmatpush.msra.mxu1 %v964_v0 }
  0xc3   : > { %1059 = vmatpush.msra.mxu0 %v950_v59 }
  0xc5   : > { %1060 = vmatpush.msra.mxu0 %v949_v63 }
  0xc6   : > { %815 = vrot.lane.b32.xlu0 %v533_v30, %s2043_s18  ;;  %622 = vrot.lane.b32.xlu1 %v388_v31, %s2043_s18  ;;  %v441_v30 = vld [vmem:[#allocation2 + $0xf0] sm:$0xff]  ;;  %v959_v31 = vld [vmem:[%s2187_s15 + $0x80] sm:$0xff] }
  0xc7   : > { %1061 = vmatpush.msra.mxu0 %v948_v5  ;;  %v457_v34 = vsel %vm2316_vm3, %v440_v15, %v441_v30  ;;  %v458_v39 = vsel %vm2316_vm3, %v441_v30, %v442_v38  ;;  %v914_v30 = vld [vmem:[#allocation3 + $0x118] sm:$0xff] }
  0xc8   : > { %721 = vrot.lane.b32.xlu2 %v454_v42, %s2043_s18  ;;  %778 = vst.msk [vmem:[#allocation3 + $0x170] sm:$0xff] %vm573_vm2, %v457_v34  ;;  %v443_v42 = vld [vmem:[#allocation2 + $0x110] sm:$0xff] }
  0xc9   : > { %1062 = vmatpush.msra.mxu0 %v947_v12  ;;  %779 = vst.msk [vmem:[#allocation3 + $0x190] sm:$0xff] %vm573_vm2, %v458_v39  ;;  %v459_v43 = vsel %vm2316_vm3, %v442_v38, %v443_v42 }
  0xca   : > { %780 = vst.msk [vmem:[#allocation3 + $0x1b0] sm:$0xff] %vm573_vm2, %v459_v43 }
  0xce   : > { %817 = vrot.lane.b32.xlu0 %v2390_v61, %s2043_s18  ;;  %624 = vrot.lane.b32.xlu1 %v2411_v2, %s2043_s18  ;;  %v978_v61 = vld [vmem:[%s2187_s15 + $0x118] sm:$0xff]  ;;  %v997_v2 = vld [vmem:[%s2187_s15 + $0x1b0] sm:$0xff] }
  0xcf   : > { %1193 = vmatpush.msra.mxu2 %v978_v61  ;;  %1255 = vmatpush.msra.mxu3 %v997_v2 }
  0xd0   : > { %723 = vrot.lane.b32.xlu2 %v455_v58, %s2043_s18 }
  0xd1   : > { %1256 = vmatpush.msra.mxu3 %v996_v10 }
  0xd3   : > { %1257 = vmatpush.msra.mxu3 %v995_v18 }
  0xd5   : > { %1258 = vmatpush.msra.mxu3 %v994_v20 }
  0xd6   : > { %819 = vrot.lane.b32.xlu0 %v2403_v1, %s2043_s18  ;;  %626 = vrot.lane.b32.xlu1 %v2428_v7, %s2043_s18  ;;  %v977_v1 = vld [vmem:[%s2187_s15 + $0x110] sm:$0xff]  ;;  %v963_v7 = vld [vmem:[%s2187_s15 + $0xa0] sm:$0xff] }
  0xd7   : > { %1194 = vmatpush.msra.mxu2 %v977_v1  ;;  %1127 = vmatpush.msra.mxu1 %v963_v7  ;;  %v468_v7 = vld [vmem:[#allocation2 + $0x90] sm:$0xff] }
  0xd8   : > { %1259 = vmatpush.msra.mxu3 %v993_v25 }
  0xd9   : > { %1195 = vmatpush.msra.mxu2 %v976_v9  ;;  %1128 = vmatpush.msra.mxu1 %v962_v14  ;;  %v484_v9 = vsel %vm2316_vm3, %v2430_v8, %v468_v7  ;;  %v404_v8 = vld [vmem:[#allocation2 + $0x91] sm:$0xff] }
  0xda   : > { %v609_v21 = vpop.permute.xlu2 %608  ;;  %1260 = vmatpush.msra.mxu3 %v992_v33  ;;  %774 = vst.msk [vmem:[#allocation3 + $0xf0] sm:$0xff] %vm573_vm2, %v484_v9 }
  0xdb   : > { %1196 = vmatpush.msra.mxu2 %v975_v17  ;;  %656 = vst.msk [vmem:[#allocation3 + $0x20] sm:$0xff] %vm654_vm4, %v609_v21  ;;  %1129 = vmatpush.msra.mxu1 %v961_v19  ;;  %v906_v17 = vld [vmem:[#allocation3 + $0xd8] sm:$0xff] }
  0xdc   : > { %1261 = vmatpush.msra.mxu3 %v991_v37  ;;  %678 = vst.msk [vmem:[#allocation3 + $0xe8] sm:$0xff] %vm573_vm2, %v404_v8 }
  0xdd   : > { %1130 = vmatpush.msra.mxu1 %v960_v24 }
  0xde   : > { %821 = vrot.lane.b32.xlu0 %v2417_v6, %s2043_s18  ;;  %628 = vrot.lane.b32.xlu1 %v2453_v16, %s2043_s18  ;;  %v456_v6 = vsel %vm2316_vm3, %v439_v57, %v440_v15  ;;  %v946_v16 = vld [vmem:[%s2187_s15 + $0x18] sm:$0xff] }
  0xdf   : > { %777 = vst.msk [vmem:[#allocation3 + $0x150] sm:$0xff] %vm573_vm2, %v456_v6  ;;  %725 = vrot.lane.b32.xlu2 %v456_v6, %s2043_s18  ;;  %1063 = vmatpush.msra.mxu0 %v946_v16 }
  0xe0   : > { %1131 = vmatpush.msra.mxu1 %v959_v31 }
  0xe1   : > { %1064 = vmatpush.msra.mxu0 %v945_v22  ;;  %v910_v22 = vld [vmem:[#allocation3 + $0xf8] sm:$0xff] }
  0xe2   : > { %v883_v63 = vld [vmem:[#allocation3 + $0x20] sm:$0xff] }
  0xe3   : > { %1065 = vmatpush.msra.mxu0 %v944_v27 }
  0xe5   : > { %1066 = vmatpush.msra.mxu0 %v943_v36 }
  0xe6   : > { %823 = vrot.lane.b32.xlu0 %v2441_v13, %s2043_s18  ;;  %630 = vrot.lane.b32.xlu1 %v2483_v35, %s2043_s18  ;;  %v882_v13 = vld [vmem:[#allocation3 + $0x18] sm:$0xff]  ;;  %v706_v35 = vpop.permute.xlu2 %705 }
  0xe7   : > { %752 = vst.msk [vmem:[#allocation3 + $0x28] sm:$0xff] %vm654_vm4, %v706_v35  ;;  %727 = vrot.lane.b32.xlu2 %v457_v34, %s2043_s18  ;;  %1665 = vmatmul.msk.f32.vlgmr.msra.gmra.mxu3 %vm573_vm2, %v882_v13  ;;  %v918_v35 = vld [vmem:[#allocation3 + $0x138] sm:$0xff] }
  0xee   : > { %825 = vrot.lane.b32.xlu0 %v2475_v32, %s2043_s18  ;;  %632 = vrot.lane.b32.xlu1 %v2515_v52, %s2043_s18  ;;  %v708_v41 = vpop.permute.xlu2 %707  ;;  %v884_v55 = vld [vmem:[#allocation3 + $0x28] sm:$0xff] }
  0xef   : > { %753 = vst.msk [vmem:[#allocation3 + $0x48] sm:$0xff] %vm654_vm4, %v708_v41  ;;  %729 = vrot.lane.b32.xlu2 %v458_v39, %s2043_s18  ;;  %1666 = vmatmul.msk.f32.gmra.mxu3 %vm573_vm2, %v886_v40 }
  0xf6   : > { %827 = vrot.lane.b32.xlu0 %v2504_v48, %s2043_s18  ;;  %634 = vrot.lane.b32.xlu1 %v2551_v11, %s2043_s18  ;;  %v710_v46 = vpop.permute.xlu2 %709  ;;  %v460_v48 = vsel %vm2316_vm3, %v443_v42, %v2615_v47  ;;  %v888_v62 = vld [vmem:[#allocation3 + $0x48] sm:$0xff] }
  0xf7   : > { %731 = vrot.lane.b32.xlu2 %v459_v43, %s2043_s18  ;;  %754 = vst.msk [vmem:[#allocation3 + $0x68] sm:$0xff] %vm654_vm4, %v710_v46  ;;  %1667 = vmatmul.msk.f32.gmra.mxu3 %vm573_vm2, %v890_v45 }
  0xf8   : > { %v800_v32 = vpop.permute.xlu0 %799  ;;  %v704_v44 = vpop.permute.xlu1 %703  ;;  %781 = vst.msk [vmem:[#allocation3 + $0x1d0] sm:$0xff] %vm573_vm2, %v460_v48 }
  0xf9   : > { %847 = vst.msk [vmem:[#allocation3 + $0x10] sm:$0xff] %vm654_vm4, %v800_v32  ;;  %v922_v32 = vld [vmem:[#allocation3 + $0x158] sm:$0xff] }
  0xfa   : > { %751 = vst.msk [vmem:[#allocation3 + $0x8] sm:$0xff] %vm654_vm4, %v704_v44 }
  0xfe   : > { %829 = vrot.lane.b32.xlu0 %v2543_v4, %s2043_s18  ;;  %636 = vrot.lane.b32.xlu1 %v395_v28, %s2043_s18  ;;  %v712_v54 = vpop.permute.xlu2 %711  ;;  %v403_v4 = vld [vmem:[#allocation2 + $0x81] sm:$0xff] }
  0xff   : > { %733 = vrot.lane.b32.xlu2 %v460_v48, %s2043_s18  ;;  %755 = vst.msk [vmem:[#allocation3 + $0x88] sm:$0xff] %vm654_vm4, %v712_v54  ;;  %1668 = vmatmul.msk.f32.gmra.mxu3 %vm573_vm2, %v894_v53  ;;  %v892_v11 = vld [vmem:[#allocation3 + $0x68] sm:$0xff] }
 0x100   : > { %v607_v49 = vpop.permute.xlu0 %606  ;;  %v881_v50 = vld [vmem:[#allocation3 + $0x10] sm:$0xff]  ;;  %v802_v51 = vpop.permute.xlu1 %801  ;;  %677 = vst.msk [vmem:[#allocation3 + $0xc8] sm:$0xff] %vm573_vm2, %v403_v4 }
 0x101   : > { %655 = vst.msk [vmem:[#allocation3] sm:$0xff] %vm654_vm4, %v607_v49  ;;  %1197 = vmatmul.f32.vlgmr.msra.gmra.mxu2 %v881_v50  ;;  %v880_v52 = vld [vmem:[#allocation3 + $0x8] sm:$0xff] }
 0x102   : > { %848 = vst.msk [vmem:[#allocation3 + $0x30] sm:$0xff] %vm654_vm4, %v802_v51  ;;  %1132 = vmatmul.f32.vlgmr.msra.gmra.mxu1 %v880_v52  ;;  %v926_v51 = vld [vmem:[#allocation3 + $0x178] sm:$0xff] }
 0x103   : > { %581 = vst.msk [vmem:[#allocation3 + $0xe0] sm:$0xff] %vm573_vm2, %v403_v4 }
 0x106   : > { %v714_v61 = vpop.permute.xlu2 %713  ;;  %v896_v16 = vld [vmem:[#allocation3 + $0x88] sm:$0xff] }
 0x107   : > { %756 = vst.msk [vmem:[#allocation3 + $0xa8] sm:$0xff] %vm654_vm4, %v714_v61  ;;  %1669 = vmatmul.msk.f32.gmra.mxu3 %vm573_vm2, %v898_v60 }
 0x108   : > { %v879_v56 = vld [vmem:[#allocation3] sm:$0xff]  ;;  %v804_v57 = vpop.permute.xlu0 %803  ;;  %v611_v58 = vpop.permute.xlu1 %610 }
 0x109   : > { %1067 = vmatmul.f32.vlgmr.msra.gmra.mxu0 %v879_v56  ;;  %849 = vst.msk [vmem:[#allocation3 + $0x50] sm:$0xff] %vm654_vm4, %v804_v57  ;;  %v885_v59 = vld [vmem:[#allocation3 + $0x30] sm:$0xff] }
 0x10a   : > { %1200 = vmatmul.f32.gmra.mxu2 %v885_v59  ;;  %657 = vst.msk [vmem:[#allocation3 + $0x40] sm:$0xff] %vm654_vm4, %v611_v58  ;;  %1135 = vmatmul.f32.gmra.mxu1 %v884_v55  ;;  %v930_v58 = vld [vmem:[#allocation3 + $0x198] sm:$0xff] }
 0x10e   : > { %v716_v5 = vpop.permute.xlu2 %715  ;;  %v900_v25 = vld [vmem:[#allocation3 + $0xa8] sm:$0xff] }
 0x10f   : > { %1670 = vmatmul.msk.f32.gmra.mxu3 %vm573_vm2, %v902_v3  ;;  %757 = vst.msk [vmem:[#allocation3 + $0xc8] sm:$0xff] %vm654_vm4, %v716_v5  ;;  %v476_v3 = vld [vmem:[#allocation2 + $0x130] sm:$0xff] }
 0x110   : > { %v806_v0 = vpop.permute.xlu0 %805  ;;  %v889_v1 = vld [vmem:[#allocation3 + $0x50] sm:$0xff]  ;;  %v613_v2 = vpop.permute.xlu1 %612  ;;  %v492_v4 = vsel %vm2316_vm3, %v2615_v47, %v476_v3 }
 0x111   : > { %1070 = vmatmul.f32.gmra.mxu0 %v883_v63  ;;  %850 = vst.msk [vmem:[#allocation3 + $0x70] sm:$0xff] %vm654_vm4, %v806_v0  ;;  %v887_v10 = vld [vmem:[#allocation3 + $0x40] sm:$0xff]  ;;  %v412_v47 = vld [vmem:[#allocation2 + $0x131] sm:$0xff] }
 0x112   : > { %1203 = vmatmul.f32.gmra.mxu2 %v889_v1  ;;  %658 = vst.msk [vmem:[#allocation3 + $0x60] sm:$0xff] %vm654_vm4, %v613_v2  ;;  %1138 = vmatmul.f32.gmra.mxu1 %v888_v62  ;;  %v934_v1 = vld [vmem:[#allocation3 + $0x1b8] sm:$0xff]  ;;  %v411_v2 = vld [vmem:[#allocation2 + $0x121] sm:$0xff] }
 0x113   : > { %685 = vst.msk [vmem:[#allocation3 + $0x1c8] sm:$0xff] %vm573_vm2, %v411_v2 }
 0x114   : > { %782 = vst.msk [vmem:[#allocation3 + $0x1f0] sm:$0xff] %vm573_vm2, %v492_v4 }
 0x115   : > { %589 = vst.msk [vmem:[#allocation3 + $0x1e0] sm:$0xff] %vm573_vm2, %v411_v2 }
 0x116   : > { %v718_v18 = vpop.permute.xlu2 %717  ;;  %v904_v34 = vld [vmem:[#allocation3 + $0xc8] sm:$0xff]  ;;  %686 = vst.msk [vmem:[#allocation3 + $0x1e8] sm:$0xff] %vm573_vm2, %v412_v47 }
 0x117   : > { %1671 = vmatmul.msk.f32.gmra.mxu3 %vm573_vm2, %v906_v17  ;;  %758 = vst.msk [vmem:[#allocation3 + $0xe8] sm:$0xff] %vm654_vm4, %v718_v18 }
 0x118   : > { %v808_v12 = vpop.permute.xlu0 %807  ;;  %v893_v14 = vld [vmem:[#allocation3 + $0x70] sm:$0xff]  ;;  %v615_v15 = vpop.permute.xlu1 %614 }
 0x119   : > { %1073 = vmatmul.f32.gmra.mxu0 %v887_v10  ;;  %851 = vst.msk [vmem:[#allocation3 + $0x90] sm:$0xff] %vm654_vm4, %v808_v12  ;;  %v891_v6 = vld [vmem:[#allocation3 + $0x60] sm:$0xff] }
 0x11a   : > { %1206 = vmatmul.f32.gmra.mxu2 %v893_v14  ;;  %659 = vst.msk [vmem:[#allocation3 + $0x80] sm:$0xff] %vm654_vm4, %v615_v15  ;;  %1141 = vmatmul.f32.gmra.mxu1 %v892_v11 }
 0x11e   : > { %v720_v23 = vpop.permute.xlu2 %719  ;;  %v908_v40 = vld [vmem:[#allocation3 + $0xe8] sm:$0xff] }
 0x11f   : > { %759 = vst.msk [vmem:[#allocation3 + $0x108] sm:$0xff] %vm654_vm4, %v720_v23  ;;  %1672 = vmatmul.msk.f32.gmra.mxu3 %vm573_vm2, %v910_v22 }
 0x120   : > { %v810_v19 = vpop.permute.xlu0 %809  ;;  %v897_v20 = vld [vmem:[#allocation3 + $0x90] sm:$0xff]  ;;  %v617_v21 = vpop.permute.xlu1 %616 }
 0x121   : > { %1076 = vmatmul.f32.gmra.mxu0 %v891_v6  ;;  %852 = vst.msk [vmem:[#allocation3 + $0xb0] sm:$0xff] %vm654_vm4, %v810_v19  ;;  %v895_v24 = vld [vmem:[#allocation3 + $0x80] sm:$0xff] }
 0x122   : > { %1209 = vmatmul.f32.gmra.mxu2 %v897_v20  ;;  %660 = vst.msk [vmem:[#allocation3 + $0xa0] sm:$0xff] %vm654_vm4, %v617_v21  ;;  %1144 = vmatmul.f32.gmra.mxu1 %v896_v16  ;;  %v942_v16 = vld [vmem:[#allocation3 + $0x1f8] sm:$0xff] }
 0x126   : > { %v722_v31 = vpop.permute.xlu2 %721  ;;  %v912_v46 = vld [vmem:[#allocation3 + $0x108] sm:$0xff] }
 0x127   : > { %760 = vst.msk [vmem:[#allocation3 + $0x128] sm:$0xff] %vm654_vm4, %v722_v31  ;;  %1673 = vmatmul.msk.f32.gmra.mxu3 %vm573_vm2, %v914_v30 }
 0x128   : > { %v812_v26 = vpop.permute.xlu0 %811  ;;  %v901_v27 = vld [vmem:[#allocation3 + $0xb0] sm:$0xff]  ;;  %v619_v28 = vpop.permute.xlu1 %618 }
 0x129   : > { %1079 = vmatmul.f32.gmra.mxu0 %v895_v24  ;;  %853 = vst.msk [vmem:[#allocation3 + $0xd0] sm:$0xff] %vm654_vm4, %v812_v26  ;;  %v899_v33 = vld [vmem:[#allocation3 + $0xa0] sm:$0xff] }
 0x12a   : > { %1212 = vmatmul.f32.gmra.mxu2 %v901_v27  ;;  %661 = vst.msk [vmem:[#allocation3 + $0xc0] sm:$0xff] %vm654_vm4, %v619_v28  ;;  %1147 = vmatmul.f32.gmra.mxu1 %v900_v25 }
 0x12e   : > { %v724_v38 = vpop.permute.xlu2 %723  ;;  %v916_v54 = vld [vmem:[#allocation3 + $0x128] sm:$0xff] }
 0x12f   : > { %761 = vst.msk [vmem:[#allocation3 + $0x148] sm:$0xff] %vm654_vm4, %v724_v38  ;;  %1674 = vmatmul.msk.f32.gmra.mxu3 %vm573_vm2, %v918_v35  ;;  %v2699_v38 = vld [vmem:[%s226_s12] ss:$0 sm:$0xff] }
 0x130   : > { %v814_v36 = vpop.permute.xlu0 %813  ;;  %v905_v37 = vld [vmem:[#allocation3 + $0xd0] sm:$0xff]  ;;  %v621_v13 = vpop.permute.xlu1 %620 }
 0x131   : > { %1082 = vmatmul.f32.gmra.mxu0 %v899_v33  ;;  %854 = vst.msk [vmem:[#allocation3 + $0xf0] sm:$0xff] %vm654_vm4, %v814_v36  ;;  %v903_v39 = vld [vmem:[#allocation3 + $0xc0] sm:$0xff] }
 0x132   : > { %1215 = vmatmul.f32.gmra.mxu2 %v905_v37  ;;  %662 = vst.msk [vmem:[#allocation3 + $0xe0] sm:$0xff] %vm654_vm4, %v621_v13  ;;  %1150 = vmatmul.f32.gmra.mxu1 %v904_v34 }
 0x136   : > { %v920_v61 = vld [vmem:[#allocation3 + $0x148] sm:$0xff] }
 0x137   : > { %1675 = vmatmul.msk.f32.gmra.mxu3 %vm573_vm2, %v922_v32 }
 0x138   : > { %v816_v41 = vpop.permute.xlu0 %815  ;;  %v909_v42 = vld [vmem:[#allocation3 + $0xf0] sm:$0xff]  ;;  %v623_v43 = vpop.permute.xlu1 %622 }
 0x139   : > { %1085 = vmatmul.f32.gmra.mxu0 %v903_v39  ;;  %855 = vst.msk [vmem:[#allocation3 + $0x110] sm:$0xff] %vm654_vm4, %v816_v41  ;;  %v726_v44 = vpop.permute.xlu2 %725  ;;  %v907_v45 = vld [vmem:[#allocation3 + $0xe0] sm:$0xff] }
 0x13a   : > { %1218 = vmatmul.f32.gmra.mxu2 %v909_v42  ;;  %663 = vst.msk [vmem:[#allocation3 + $0x100] sm:$0xff] %vm654_vm4, %v623_v43  ;;  %1153 = vmatmul.f32.gmra.mxu1 %v908_v40 }
 0x13b   : > { %762 = vst.msk [vmem:[#allocation3 + $0x168] sm:$0xff] %vm654_vm4, %v726_v44 }
 0x13f   : > { %1676 = vmatmul.msk.f32.gmra.mxu3 %vm573_vm2, %v926_v51 }
 0x140   : > { %v818_v48 = vpop.permute.xlu0 %817  ;;  %v913_v49 = vld [vmem:[#allocation3 + $0x110] sm:$0xff]  ;;  %v625_v50 = vpop.permute.xlu1 %624 }
 0x141   : > { %1088 = vmatmul.f32.gmra.mxu0 %v907_v45  ;;  %856 = vst.msk [vmem:[#allocation3 + $0x130] sm:$0xff] %vm654_vm4, %v818_v48  ;;  %v728_v52 = vpop.permute.xlu2 %727  ;;  %v911_v53 = vld [vmem:[#allocation3 + $0x100] sm:$0xff] }
 0x142   : > { %1221 = vmatmul.f32.gmra.mxu2 %v913_v49  ;;  %664 = vst.msk [vmem:[#allocation3 + $0x120] sm:$0xff] %vm654_vm4, %v625_v50  ;;  %1156 = vmatmul.f32.gmra.mxu1 %v912_v46  ;;  %v924_v9 = vld [vmem:[#allocation3 + $0x168] sm:$0xff] }
 0x143   : > { %763 = vst.msk [vmem:[#allocation3 + $0x188] sm:$0xff] %vm654_vm4, %v728_v52 }
 0x147   : > { %1677 = vmatmul.msk.f32.gmra.mxu3 %vm573_vm2, %v930_v58 }
 0x148   : > { %v820_v55 = vpop.permute.xlu0 %819  ;;  %v917_v56 = vld [vmem:[#allocation3 + $0x130] sm:$0xff]  ;;  %v627_v57 = vpop.permute.xlu1 %626 }
 0x149   : > { %1091 = vmatmul.f32.gmra.mxu0 %v911_v53  ;;  %857 = vst.msk [vmem:[#allocation3 + $0x150] sm:$0xff] %vm654_vm4, %v820_v55  ;;  %v730_v59 = vpop.permute.xlu2 %729  ;;  %v915_v60 = vld [vmem:[#allocation3 + $0x120] sm:$0xff] }
 0x14a   : > { %1224 = vmatmul.f32.gmra.mxu2 %v917_v56  ;;  %665 = vst.msk [vmem:[#allocation3 + $0x140] sm:$0xff] %vm654_vm4, %v627_v57  ;;  %1159 = vmatmul.f32.gmra.mxu1 %v916_v54  ;;  %v928_v17 = vld [vmem:[#allocation3 + $0x188] sm:$0xff] }
 0x14b   : > { %764 = vst.msk [vmem:[#allocation3 + $0x1a8] sm:$0xff] %vm654_vm4, %v730_v59 }
 0x14f   : > { %1678 = vmatmul.msk.f32.gmra.mxu3 %vm573_vm2, %v934_v1 }
 0x150   : > { %v822_v62 = vpop.permute.xlu0 %821  ;;  %v921_v63 = vld [vmem:[#allocation3 + $0x150] sm:$0xff]  ;;  %v629_v0 = vpop.permute.xlu1 %628 }
 0x151   : > { %1094 = vmatmul.f32.gmra.mxu0 %v915_v60  ;;  %858 = vst.msk [vmem:[#allocation3 + $0x170] sm:$0xff] %vm654_vm4, %v822_v62  ;;  %v732_v5 = vpop.permute.xlu2 %731  ;;  %v919_v7 = vld [vmem:[#allocation3 + $0x140] sm:$0xff] }
 0x152   : > { %1227 = vmatmul.f32.gmra.mxu2 %v921_v63  ;;  %666 = vst.msk [vmem:[#allocation3 + $0x160] sm:$0xff] %vm654_vm4, %v629_v0  ;;  %1162 = vmatmul.f32.gmra.mxu1 %v920_v61  ;;  %v932_v20 = vld [vmem:[#allocation3 + $0x1a8] sm:$0xff] }
 0x153   : > { %765 = vst.msk [vmem:[#allocation3 + $0x1c8] sm:$0xff] %vm654_vm4, %v732_v5 }
 0x157   : > { %1679 = vmatmul.msk.f32.gmra.mxu3 %vm573_vm2, %v938_v29 }
 0x158   : > { %v824_v10 = vpop.permute.xlu0 %823  ;;  %v925_v11 = vld [vmem:[#allocation3 + $0x170] sm:$0xff]  ;;  %v631_v12 = vpop.permute.xlu1 %630 }
 0x159   : > { %1097 = vmatmul.f32.gmra.mxu0 %v919_v7  ;;  %859 = vst.msk [vmem:[#allocation3 + $0x190] sm:$0xff] %vm654_vm4, %v824_v10  ;;  %v734_v14 = vpop.permute.xlu2 %733  ;;  %v923_v15 = vld [vmem:[#allocation3 + $0x160] sm:$0xff] }
 0x15a   : > { %1230 = vmatmul.f32.gmra.mxu2 %v925_v11  ;;  %667 = vst.msk [vmem:[#allocation3 + $0x180] sm:$0xff] %vm654_vm4, %v631_v12  ;;  %1165 = vmatmul.f32.gmra.mxu1 %v924_v9  ;;  %v936_v25 = vld [vmem:[#allocation3 + $0x1c8] sm:$0xff] }
 0x15b   : > { %766 = vst.msk [vmem:[#allocation3 + $0x1e8] sm:$0xff] %vm654_vm4, %v734_v14 }
 0x15f   : > { %1680 = vmatmul.msk.f32.gmra.mxu3 %vm573_vm2, %v942_v16 }
 0x160   : > { %v826_v8 = vpop.permute.xlu0 %825  ;;  %v929_v18 = vld [vmem:[#allocation3 + $0x190] sm:$0xff]  ;;  %v633_v6 = vpop.permute.xlu1 %632 }
 0x161   : > { %1100 = vmatmul.f32.gmra.mxu0 %v923_v15  ;;  %860 = vst.msk [vmem:[#allocation3 + $0x1b0] sm:$0xff] %vm654_vm4, %v826_v8  ;;  %v927_v19 = vld [vmem:[#allocation3 + $0x180] sm:$0xff] }
 0x162   : > { %1233 = vmatmul.f32.gmra.mxu2 %v929_v18  ;;  %668 = vst.msk [vmem:[#allocation3 + $0x1a0] sm:$0xff] %vm654_vm4, %v633_v6  ;;  %1168 = vmatmul.f32.gmra.mxu1 %v928_v17  ;;  %v940_v33 = vld [vmem:[#allocation3 + $0x1e8] sm:$0xff] }
 0x168   : > { %v828_v21 = vpop.permute.xlu0 %827  ;;  %v933_v22 = vld [vmem:[#allocation3 + $0x1b0] sm:$0xff]  ;;  %v635_v23 = vpop.permute.xlu1 %634 }
 0x169   : > { %1103 = vmatmul.f32.gmra.mxu0 %v927_v19  ;;  %861 = vst.msk [vmem:[#allocation3 + $0x1d0] sm:$0xff] %vm654_vm4, %v828_v21  ;;  %v931_v24 = vld [vmem:[#allocation3 + $0x1a0] sm:$0xff] }
 0x16a   : > { %1236 = vmatmul.f32.gmra.mxu2 %v933_v22  ;;  %669 = vst.msk [vmem:[#allocation3 + $0x1c0] sm:$0xff] %vm654_vm4, %v635_v23  ;;  %1171 = vmatmul.f32.gmra.mxu1 %v932_v20  ;;  %v1263_v26 = vpop.f32.mrf.mxu3 }
 0x170   : > { %v830_v27 = vpop.permute.xlu0 %829  ;;  %v937_v28 = vld [vmem:[#allocation3 + $0x1d0] sm:$0xff]  ;;  %v637_v30 = vpop.permute.xlu1 %636 }
 0x171   : > { %1106 = vmatmul.f32.gmra.mxu0 %v931_v24  ;;  %862 = vst.msk [vmem:[#allocation3 + $0x1f0] sm:$0xff] %vm654_vm4, %v830_v27  ;;  %v935_v31 = vld [vmem:[#allocation3 + $0x1c0] sm:$0xff] }
 0x172   : > { %1239 = vmatmul.f32.gmra.mxu2 %v937_v28  ;;  %670 = vst.msk [vmem:[#allocation3 + $0x1e0] sm:$0xff] %vm654_vm4, %v637_v30  ;;  %1174 = vmatmul.f32.gmra.mxu1 %v936_v25  ;;  %v1266_v34 = vpop.f32.mrf.mxu3 }
 0x178   : > { %v941_v36 = vld [vmem:[#allocation3 + $0x1f0] sm:$0xff] }
 0x179   : > { %1109 = vmatmul.f32.gmra.mxu0 %v935_v31  ;;  %v939_v37 = vld [vmem:[#allocation3 + $0x1e0] sm:$0xff] }
 0x17a   : > { %1242 = vmatmul.f32.gmra.mxu2 %v941_v36  ;;  %1177 = vmatmul.f32.gmra.mxu1 %v940_v33  ;;  %v1269_v35 = vpop.f32.mrf.mxu3 }
 0x17f   : > { %v1133_v13 = vpop.f32.mrf.mxu1 }
 0x181   : > { %1112 = vmatmul.f32.gmra.mxu0 %v939_v37 }
 0x182   : > { %v1272_v32 = vpop.f32.mrf.mxu3 }
 0x184   : > { %v1198_v39 = vpop.f32.mrf.mxu2 }
 0x186   : > { %v1068_v40 = vpop.f32.mrf.mxu0 }
 0x187   : > { %v1069_v41 = vadd.f32 %v2699_v38, %v1068_v40  ;;  %v1136_v42 = vpop.f32.mrf.mxu1 }
 0x189   : > { %v1134_v43 = vadd.f32 %v1133_v13, %v1069_v41 }
 0x18a   : > { %v1275_v54 = vpop.f32.mrf.mxu3 }
 0x18b   : > { %v1199_v44 = vadd.f32 %v1198_v39, %v1134_v43 }
 0x18d   : > { %v2702_v45 = vadd.f32 %v1263_v26, %v1199_v44  ;;  %v1201_v46 = vpop.f32.mrf.mxu2 }
 0x18e   : > { %v1071_v48 = vpop.f32.mrf.mxu0 }
 0x18f   : > { %v1311_v49 = vmax.f32 %v2702_v45, 0.0  ;;  %v1072_v50 = vadd.f32 %v2699_v38, %v1071_v48  ;;  %v1139_v51 = vpop.f32.mrf.mxu1 }
 0x191   : > { %v1137_v52 = vadd.f32 %v1136_v42, %v1072_v50 }
 0x192   : > { %v1278_v2 = vpop.f32.mrf.mxu3 }
 0x193   : > { %v1202_v53 = vadd.f32 %v1201_v46, %v1137_v52 }
 0x195   : > { %v2706_v55 = vadd.f32 %v1266_v34, %v1202_v53  ;;  %v1204_v56 = vpop.f32.mrf.mxu2 }
 0x196   : > { %v1074_v57 = vpop.f32.mrf.mxu0 }
 0x197   : > { %v1312_v58 = vmax.f32 %v2706_v55, 0.0  ;;  %v1075_v59 = vadd.f32 %v2699_v38, %v1074_v57  ;;  %v1142_v60 = vpop.f32.mrf.mxu1 }
 0x199   : > { %v1140_v61 = vadd.f32 %v1139_v51, %v1075_v59 }
 0x19a   : > { %v1281_v15 = vpop.f32.mrf.mxu3 }
 0x19b   : > { %v1205_v62 = vadd.f32 %v1204_v56, %v1140_v61 }
 0x19d   : > { %v2710_v63 = vadd.f32 %v1269_v35, %v1205_v62  ;;  %v1207_v0 = vpop.f32.mrf.mxu2 }
 0x19e   : > { %v1077_v1 = vpop.f32.mrf.mxu0 }
 0x19f   : > { %v1313_v3 = vmax.f32 %v2710_v63, 0.0  ;;  %v1078_v4 = vadd.f32 %v2699_v38, %v1077_v1  ;;  %v1145_v5 = vpop.f32.mrf.mxu1 }
 0x1a1   : > { %v1143_v7 = vadd.f32 %v1142_v60, %v1078_v4 }
 0x1a2   : > { %v1284_v23 = vpop.f32.mrf.mxu3 }
 0x1a3   : > { %v1208_v9 = vadd.f32 %v1207_v0, %v1143_v7 }
 0x1a5   : > { %v2714_v10 = vadd.f32 %v1272_v32, %v1208_v9  ;;  %v1210_v11 = vpop.f32.mrf.mxu2 }
 0x1a6   : > { %v1080_v12 = vpop.f32.mrf.mxu0 }
 0x1a7   : > { %v1314_v29 = vmax.f32 %v2714_v10, 0.0  ;;  %v1081_v47 = vadd.f32 %v2699_v38, %v1080_v12  ;;  %v1148_v14 = vpop.f32.mrf.mxu1 }
 0x1a9   : > { %v1146_v17 = vadd.f32 %v1145_v5, %v1081_v47 }
 0x1aa   : > { %v1287_v36 = vpop.f32.mrf.mxu3 }
 0x1ab   : > { %v1211_v8 = vadd.f32 %v1210_v11, %v1146_v17 }
 0x1ad   : > { %v2718_v18 = vadd.f32 %v1275_v54, %v1211_v8  ;;  %v1213_v6 = vpop.f32.mrf.mxu2 }
 0x1ae   : > { %v1083_v16 = vpop.f32.mrf.mxu0 }
 0x1af   : > { %v1315_v19 = vmax.f32 %v2718_v18, 0.0  ;;  %v1084_v20 = vadd.f32 %v2699_v38, %v1083_v16  ;;  %v1151_v21 = vpop.f32.mrf.mxu1 }
 0x1b1   : > { %v1149_v22 = vadd.f32 %v1148_v14, %v1084_v20 }
 0x1b2   : > { %v1290_v48 = vpop.f32.mrf.mxu3 }
 0x1b3   : > { %v1214_v24 = vadd.f32 %v1213_v6, %v1149_v22 }
 0x1b5   : > { %v2722_v25 = vadd.f32 %v1278_v2, %v1214_v24  ;;  %v1216_v26 = vpop.f32.mrf.mxu2 }
 0x1b6   : > { %v1086_v27 = vpop.f32.mrf.mxu0 }
 0x1b7   : > { %v1316_v28 = vmax.f32 %v2722_v25, 0.0  ;;  %v1087_v30 = vadd.f32 %v2699_v38, %v1086_v27  ;;  %v1154_v31 = vpop.f32.mrf.mxu1 }
 0x1b9   : > { %v1152_v33 = vadd.f32 %v1151_v21, %v1087_v30 }
 0x1ba   : > { %v1293_v0 = vpop.f32.mrf.mxu3 }
 0x1bb   : > { %v1217_v34 = vadd.f32 %v1216_v26, %v1152_v33 }
 0x1bd   : > { %v2726_v37 = vadd.f32 %v1281_v15, %v1217_v34  ;;  %v1219_v13 = vpop.f32.mrf.mxu2 }
 0x1be   : > { %v1089_v35 = vpop.f32.mrf.mxu0 }
 0x1bf   : > { %v1317_v39 = vmax.f32 %v2726_v37, 0.0  ;;  %v1090_v40 = vadd.f32 %v2699_v38, %v1089_v35  ;;  %v1157_v41 = vpop.f32.mrf.mxu1 }
 0x1c1   : > { %v1155_v42 = vadd.f32 %v1154_v31, %v1090_v40 }
 0x1c2   : > { %v1296_v14 = vpop.f32.mrf.mxu3 }
 0x1c3   : > { %v1220_v43 = vadd.f32 %v1219_v13, %v1155_v42 }
 0x1c5   : > { %v2730_v32 = vadd.f32 %v1284_v23, %v1220_v43  ;;  %v1222_v44 = vpop.f32.mrf.mxu2 }
 0x1c6   : > { %v1092_v46 = vpop.f32.mrf.mxu0 }
 0x1c7   : > { %v1318_v50 = vmax.f32 %v2730_v32, 0.0  ;;  %v1093_v51 = vadd.f32 %v2699_v38, %v1092_v46  ;;  %v1160_v52 = vpop.f32.mrf.mxu1 }
 0x1c9   : > { %v1158_v53 = vadd.f32 %v1157_v41, %v1093_v51 }
 0x1ca   : > { %v1299_v24 = vpop.f32.mrf.mxu3 }
 0x1cb   : > { %v1223_v54 = vadd.f32 %v1222_v44, %v1158_v53 }
 0x1cd   : > { %v2734_v56 = vadd.f32 %v1287_v36, %v1223_v54  ;;  %v1225_v57 = vpop.f32.mrf.mxu2 }
 0x1ce   : > { %v1095_v59 = vpop.f32.mrf.mxu0 }
 0x1cf   : > { %v1319_v60 = vmax.f32 %v2734_v56, 0.0  ;;  %v1096_v61 = vadd.f32 %v2699_v38, %v1095_v59  ;;  %v1163_v62 = vpop.f32.mrf.mxu1 }
 0x1d1   : > { %v1161_v1 = vadd.f32 %v1160_v52, %v1096_v61 }
 0x1d2   : > { %v1302_v42 = vpop.f32.mrf.mxu3 }
 0x1d3   : > { %v1226_v2 = vadd.f32 %v1225_v57, %v1161_v1 }
 0x1d5   : > { %v2738_v4 = vadd.f32 %v1290_v48, %v1226_v2  ;;  %v1228_v5 = vpop.f32.mrf.mxu2 }
 0x1d6   : > { %v1098_v7 = vpop.f32.mrf.mxu0 }
 0x1d7   : > { %v1320_v9 = vmax.f32 %v2738_v4, 0.0  ;;  %v1099_v11 = vadd.f32 %v2699_v38, %v1098_v7  ;;  %v1166_v12 = vpop.f32.mrf.mxu1 }
 0x1d9   : > { %v1164_v47 = vadd.f32 %v1163_v62, %v1099_v11 }
 0x1da   : > { %v1305_v61 = vpop.f32.mrf.mxu3 }
 0x1db   : > { %v1229_v15 = vadd.f32 %v1228_v5, %v1164_v47 }
 0x1dd   : > { %v2742_v17 = vadd.f32 %v1293_v0, %v1229_v15  ;;  %v1231_v8 = vpop.f32.mrf.mxu2 }
 0x1de   : > { %v1101_v6 = vpop.f32.mrf.mxu0 }
 0x1df   : > { %v1321_v16 = vmax.f32 %v2742_v17, 0.0  ;;  %v1102_v20 = vadd.f32 %v2699_v38, %v1101_v6  ;;  %v1169_v21 = vpop.f32.mrf.mxu1 }
 0x1e1   : > { %v1167_v22 = vadd.f32 %v1166_v12, %v1102_v20 }
 0x1e3   : > { %v1232_v23 = vadd.f32 %v1231_v8, %v1167_v22 }
 0x1e5   : > { %v2746_v26 = vadd.f32 %v1296_v14, %v1232_v23  ;;  %v1234_v27 = vpop.f32.mrf.mxu2  ;;  %v1308_v14 = vpop.f32.mrf.mxu3 }
 0x1e6   : > { %v1104_v30 = vpop.f32.mrf.mxu0 }
 0x1e7   : > { %v1322_v31 = vmax.f32 %v2746_v26, 0.0  ;;  %v1105_v33 = vadd.f32 %v2699_v38, %v1104_v30  ;;  %v1172_v36 = vpop.f32.mrf.mxu1 }
 0x1e9   : > { %v1170_v34 = vadd.f32 %v1169_v21, %v1105_v33 }
 0x1eb   : > { %v1235_v13 = vadd.f32 %v1234_v27, %v1170_v34 }
 0x1ed   : > { %v1300_v35 = vadd.f32 %v1299_v24, %v1235_v13  ;;  %v1237_v40 = vpop.f32.mrf.mxu2 }
 0x1ee   : > { %v1107_v41 = vpop.f32.mrf.mxu0 }
 0x1ef   : > { %v1323_v43 = vmax.f32 %v1300_v35, 0.0  ;;  %v1108_v44 = vadd.f32 %v2699_v38, %v1107_v41  ;;  %v1175_v51 = vpop.f32.mrf.mxu1 }
 0x1f1   : > { %v1173_v46 = vadd.f32 %v1172_v36, %v1108_v44 }
 0x1f3   : > { %v1238_v48 = vadd.f32 %v1237_v40, %v1173_v46 }
 0x1f5   : > { %v1303_v52 = vadd.f32 %v1302_v42, %v1238_v48  ;;  %v1240_v54 = vpop.f32.mrf.mxu2 }
 0x1f6   : > { %v1110_v53 = vpop.f32.mrf.mxu0 }
 0x1f7   : > { %v1324_v57 = vmax.f32 %v1303_v52, 0.0  ;;  %v1111_v59 = vadd.f32 %v2699_v38, %v1110_v53  ;;  %v1178_v5 = vpop.f32.mrf.mxu1 }
 0x1f9   : > { %v1176_v62 = vadd.f32 %v1175_v51, %v1111_v59 }
 0x1fb   : > { %v1241_v0 = vadd.f32 %v1240_v54, %v1176_v62 }
 0x1fd   : > { %v1306_v1 = vadd.f32 %v1305_v61, %v1241_v0  ;;  %v1243_v12 = vpop.f32.mrf.mxu2 }
 0x1fe   : > { %v1113_v2 = vpop.f32.mrf.mxu0 }
 0x1ff   : > { %v1325_v7 = vmax.f32 %v1306_v1, 0.0  ;;  %v1114_v11 = vadd.f32 %v2699_v38, %v1113_v2 }
 0x201   : > { %v1179_v47 = vadd.f32 %v1178_v5, %v1114_v11 }
 0x203   : > { %v1244_v15 = vadd.f32 %v1243_v12, %v1179_v47  ;;  %1330 = sbr.rel (%p1681_p5) target bundleno = 536 (0x218), region = 60 }
 0x205   : > { %v1309_v8 = vadd.f32 %v1308_v14, %v1244_v15 }
 0x207   : > { %v1326_v6 = vmax.f32 %v1309_v8, 0.0 }
 0x208   : > { %1331 = vst.msk [vmem:[#allocation2 + $0x11] sm:$0xff] %vm573_vm2, %v1311_v49 }
 0x209   : > { %1332 = vst.msk [vmem:[#allocation2 + $0x21] sm:$0xff] %vm573_vm2, %v1312_v58 }
 0x20a   : > { %1333 = vst.msk [vmem:[#allocation2 + $0x31] sm:$0xff] %vm573_vm2, %v1313_v3 }
 0x20b   : > { %1334 = vst.msk [vmem:[#allocation2 + $0x41] sm:$0xff] %vm573_vm2, %v1314_v29 }
 0x20c   : > { %1335 = vst.msk [vmem:[#allocation2 + $0x51] sm:$0xff] %vm573_vm2, %v1315_v19 }
 0x20d   : > { %1336 = vst.msk [vmem:[#allocation2 + $0x61] sm:$0xff] %vm573_vm2, %v1316_v28 }
 0x20e   : > { %1337 = vst.msk [vmem:[#allocation2 + $0x71] sm:$0xff] %vm573_vm2, %v1317_v39 }
 0x20f   : > { %1338 = vst.msk [vmem:[#allocation2 + $0x81] sm:$0xff] %vm573_vm2, %v1318_v50 }
 0x210   : > { %1339 = vst.msk [vmem:[#allocation2 + $0xb1] sm:$0xff] %vm573_vm2, %v1319_v60 }
 0x211   : > { %1340 = vst.msk [vmem:[#allocation2 + $0xc1] sm:$0xff] %vm573_vm2, %v1320_v9 }
 0x212   : > { %1341 = vst.msk [vmem:[#allocation2 + $0xd1] sm:$0xff] %vm573_vm2, %v1321_v16 }
 0x213   : > { %1342 = vst.msk [vmem:[#allocation2 + $0xe1] sm:$0xff] %vm573_vm2, %v1322_v31 }
 0x214   : > { %1343 = vst.msk [vmem:[#allocation2 + $0xf1] sm:$0xff] %vm573_vm2, %v1323_v43 }
 0x215   : > { %1344 = vst.msk [vmem:[#allocation2 + $0x101] sm:$0xff] %vm573_vm2, %v1324_v57 }
 0x216   : > { %1345 = vst.msk [vmem:[#allocation2 + $0x111] sm:$0xff] %vm573_vm2, %v1325_v7 }
 0x217   : > { %1346 = vst.msk [vmem:[#allocation2 + $0x121] sm:$0xff] %vm573_vm2, %v1326_v6 }
 0x218 PF: > { %p1682_p8 = scmp.ne.s32.totalorder %s2094_s22, 7 }
 0x21a   : > { %1350 = sbr.rel (%p1682_p8) target bundleno = 723 (0x2d3), region = 64 }
 0x21f   : > { %1351 = vst.msk [vmem:[#allocation4] sm:$0xff] %vm573_vm2, %v1311_v49 }
 0x220   : > { %1352 = vst.msk [vmem:[#allocation4 + $0x8] sm:$0xff] %vm573_vm2, %v1312_v58 }
 0x221   : > { %1353 = vst.msk [vmem:[#allocation4 + $0x10] sm:$0xff] %vm573_vm2, %v1313_v3 }
 0x222   : > { %1354 = vst.msk [vmem:[#allocation4 + $0x18] sm:$0xff] %vm573_vm2, %v1314_v29 }
 0x223   : > { %1355 = vst.msk [vmem:[#allocation4 + $0x20] sm:$0xff] %vm573_vm2, %v1315_v19 }
 0x224   : > { %1356 = vst.msk [vmem:[#allocation4 + $0x28] sm:$0xff] %vm573_vm2, %v1316_v28 }
 0x225   : > { %1357 = vst.msk [vmem:[#allocation4 + $0x30] sm:$0xff] %vm573_vm2, %v1317_v39 }
 0x226   : > { %1358 = vst.msk [vmem:[#allocation4 + $0x38] sm:$0xff] %vm573_vm2, %v1318_v50 }
 0x227   : > { %1359 = vst.msk [vmem:[#allocation4 + $0x40] sm:$0xff] %vm573_vm2, %v1319_v60 }
 0x228   : > { %1360 = vst.msk [vmem:[#allocation4 + $0x48] sm:$0xff] %vm573_vm2, %v1320_v9 }
 0x229   : > { %1361 = vst.msk [vmem:[#allocation4 + $0x50] sm:$0xff] %vm573_vm2, %v1321_v16 }
 0x22a   : > { %1362 = vst.msk [vmem:[#allocation4 + $0x58] sm:$0xff] %vm573_vm2, %v1322_v31 }
 0x22b   : > { %1363 = vst.msk [vmem:[#allocation4 + $0x60] sm:$0xff] %vm573_vm2, %v1323_v43 }
 0x22c   : > { %1364 = vst.msk [vmem:[#allocation4 + $0x68] sm:$0xff] %vm573_vm2, %v1324_v57 }
 0x22d   : > { %1365 = vst.msk [vmem:[#allocation4 + $0x70] sm:$0xff] %vm573_vm2, %v1325_v7 }
 0x22e   : > { %1366 = vst.msk [vmem:[#allocation4 + $0x78] sm:$0xff] %vm573_vm2, %v1326_v6 }
 0x22f   : > { %1996 = dma.done.wait [#allocation6], 262144 }
 0x230   : > { %1997 = vsyncadd [#allocation6], 4294705152  ;;  %v2835_v38 = vmov 0.0   ;;  %v2837_v45 = vmov 0.0   ;;  %v2839_v49 = vmov 0.0   ;;  %v2841_v55 = vmov 0.0  }
 0x231   : > { %s2843_s10 = smov 0  }
 0x232 LB: >> { %s1694_s15 = sshll.u32 %s2036_s10, 8  ;;  %s1382_s7 = scalar_lea.vmem [#allocation4], %s2036_s10  ;;  %vm1423_vm5 = vcmask 1041409   ;;  %s2036_s10 = sphi %s2843_s10, %s1377_s10   ;;  %v2032_v55 = vphi %v2841_v55, %v2949_v55   ;;  %v2028_v49 = vphi %v2839_v49, %v2948_v49   ;;  %v2024_v45 = vphi %v2837_v45, %v2947_v45   ;;  %v2020_v38 = vphi %v2835_v38, %v2946_v38  }
 0x233   : >> { %s2861_s12 = scalar_lea.vmem [#allocation5], %s1694_s15  ;;  %s1377_s10 = sadd.s32 1, %s2036_s10  }
 0x234   : >> { %v1418_v58 = vld [vmem:[%s2861_s12 + $0xf0] sm:$0xff]  ;;  %v1419_v63 = vld [vmem:[%s2861_s12 + $0xf8] sm:$0xff]  ;;  %v1416_v19 = vld [vmem:[%s2861_s12 + $0xe0] sm:$0xff]  ;;  %p1374_p9 = scmp.ge.s32.totalorder %s1377_s10, 64  }
 0x235   : >> { %v1414_v3 = vld [vmem:[%s2861_s12 + $0xd0] sm:$0xff]  ;;  %1475 = vmatpush.msra.mxu2 %v1418_v58  ;;  %1495 = vmatpush.msra.mxu3 %v1419_v63  ;;  %v1415_v10 = vld [vmem:[%s2861_s12 + $0xd8] sm:$0xff]  ;;  %v1417_v25 = vld [vmem:[%s2861_s12 + $0xe8] sm:$0xff]  ;;  %vm1536_vm6 = vcmask (%p1374_p9), 1041408   ;;  %vm1538_vm7 = vcmask (%p1374_p9), 1045508   ;;  %vm1540_vm8 = vcmask (%p1374_p9), 1043456  }
 0x236   : >> { %v1410_v29 = vld [vmem:[%s2861_s12 + $0xb0] sm:$0xff]  ;;  %v1411_v18 = vld [vmem:[%s2861_s12 + $0xb8] sm:$0xff]  ;;  %v1412_v28 = vld [vmem:[%s2861_s12 + $0xc0] sm:$0xff]  ;;  %1435 = vmatpush.msra.mxu0 %v1416_v19  ;;  %1455 = vmatpush.msra.mxu1 %v1417_v25 }
 0x237   : >> { %1476 = vmatpush.msra.mxu2 %v1414_v3  ;;  %1496 = vmatpush.msra.mxu3 %v1415_v10  ;;  %v1413_v37 = vld [vmem:[%s2861_s12 + $0xc8] sm:$0xff]  ;;  %v1406_v39 = vld [vmem:[%s2861_s12 + $0x90] sm:$0xff]  ;;  %v1407_v32 = vld [vmem:[%s2861_s12 + $0x98] sm:$0xff] }
 0x238   : >> { %v1408_v50 = vld [vmem:[%s2861_s12 + $0xa0] sm:$0xff]  ;;  %v1409_v56 = vld [vmem:[%s2861_s12 + $0xa8] sm:$0xff]  ;;  %1436 = vmatpush.msra.mxu0 %v1412_v28  ;;  %1456 = vmatpush.msra.mxu1 %v1413_v37  ;;  %v1402_v60 = vld [vmem:[%s2861_s12 + $0x70] sm:$0xff] }
 0x239   : >> { %1477 = vmatpush.msra.mxu2 %v1410_v29  ;;  %1497 = vmatpush.msra.mxu3 %v1411_v18  ;;  %v1403_v4 = vld [vmem:[%s2861_s12 + $0x78] sm:$0xff]  ;;  %v1384_v9 = vld [vmem:[%s1382_s7 + $0x40] sm:$0x1]  ;;  %v1405_v16 = vld [vmem:[%s2861_s12 + $0x88] sm:$0xff] }
 0x23a   : >> { %v1404_v17 = vld [vmem:[%s2861_s12 + $0x80] sm:$0xff]  ;;  %1437 = vmatpush.msra.mxu0 %v1408_v50  ;;  %1457 = vmatpush.msra.mxu1 %v1409_v56  ;;  %v1398_v20 = vld [vmem:[%s2861_s12 + $0x50] sm:$0xff]  ;;  %v1399_v21 = vld [vmem:[%s2861_s12 + $0x58] sm:$0xff]  ;;  %v1422_v24 = vrot.slane %v1384_v9, 7 }
 0x23b   : >> { %1478 = vmatpush.msra.mxu2 %v1406_v39  ;;  %1498 = vmatpush.msra.mxu3 %v1407_v32  ;;  %v1400_v22 = vld [vmem:[%s2861_s12 + $0x60] sm:$0xff]  ;;  %v1401_v23 = vld [vmem:[%s2861_s12 + $0x68] sm:$0xff]  ;;  %v1394_v26 = vld [vmem:[%s2861_s12 + $0x30] sm:$0xff] }
 0x23c   : >> { %1438 = vmatpush.msra.mxu0 %v1404_v17  ;;  %1458 = vmatpush.msra.mxu1 %v1405_v16  ;;  %v1395_v27 = vld [vmem:[%s2861_s12 + $0x38] sm:$0xff]  ;;  %v1383_v30 = vld [vmem:[%s1382_s7] sm:$0x1]  ;;  %v1397_v33 = vld [vmem:[%s2861_s12 + $0x48] sm:$0xff] }
 0x23d   : >> { %1479 = vmatpush.msra.mxu2 %v1402_v60  ;;  %1499 = vmatpush.msra.mxu3 %v1403_v4  ;;  %v1396_v31 = vld [vmem:[%s2861_s12 + $0x40] sm:$0xff]  ;;  %v1390_v34 = vld [vmem:[%s2861_s12 + $0x10] sm:$0xff]  ;;  %v1391_v36 = vld [vmem:[%s2861_s12 + $0x18] sm:$0xff]  ;;  %v1424_v13 = vsel %vm1423_vm5, %v1422_v24, %v1383_v30 }
 0x23e   : >> { %1439 = vmatpush.msra.mxu0 %v1400_v22  ;;  %1459 = vmatpush.msra.mxu1 %v1401_v23  ;;  %v1392_v35 = vld [vmem:[%s2861_s12 + $0x20] sm:$0xff]  ;;  %v1393_v40 = vld [vmem:[%s2861_s12 + $0x28] sm:$0xff] }
 0x23f   : >> { %1480 = vmatpush.msra.mxu2 %v1398_v20  ;;  %1500 = vmatpush.msra.mxu3 %v1399_v21  ;;  %v1388_v41 = vld [vmem:[%s2861_s12] sm:$0xff]  ;;  %v1389_v42 = vld [vmem:[%s2861_s12 + $0x8] sm:$0xff] }
 0x240   : >> { %1440 = vmatpush.msra.mxu0 %v1396_v31  ;;  %1460 = vmatpush.msra.mxu1 %v1397_v33  ;;  %v1511_v57 = vld [vmem:[#allocation12] sm:$0xf] (%p1374_p9) }
 0x241   : >> { %1481 = vmatpush.msra.mxu2 %v1394_v26  ;;  %1501 = vmatpush.msra.mxu3 %v1395_v27  ;;  %v1513_v59 = vperm.slane (%p1374_p9), %v1511_v57, 0  ;;  %v1514_v61 = vperm.slane (%p1374_p9), %v1511_v57, 1  ;;  %v1515_v62 = vperm.slane (%p1374_p9), %v1511_v57, 2  ;;  %v1516_v0 = vperm.slane (%p1374_p9), %v1511_v57, 3 }
 0x242   : >> { %1441 = vmatpush.msra.mxu0 %v1392_v35  ;;  %1461 = vmatpush.msra.mxu1 %v1393_v40 }
 0x243   : >> { %1482 = vmatpush.msra.mxu2 %v1390_v34  ;;  %1502 = vmatpush.msra.mxu3 %v1391_v36 }
 0x244   : >> { %1687 = vmatmul.msk.f32.vlgmr.msra.gmra.mxu2 %vm573_vm2, %v1424_v13  ;;  %1688 = vmatmul.msk.f32.vlgmr.msra.gmra.mxu3 %vm573_vm2, %v1424_v13 }
 0x245   : >> { %1442 = vmatpush.msra.mxu0 %v1388_v41  ;;  %1462 = vmatpush.msra.mxu1 %v1389_v42 }
 0x246   : >> { %1685 = vmatmul.msk.f32.vlgmr.msra.gmra.mxu0 %vm573_vm2, %v1424_v13  ;;  %1686 = vmatmul.msk.f32.vlgmr.msra.gmra.mxu1 %vm573_vm2, %v1424_v13 }
 0x2c3   : >> { %v1444_v43 = vpop.f32.mrf.mxu0  ;;  %v1464_v44 = vpop.f32.mrf.mxu1 }
 0x2c4   : >> { %v1507_v46 = vadd.f32 %v2032_v55, %v1444_v43   ;;  %v1508_v48 = vadd.f32 %v2028_v49, %v1464_v44  }
 0x2c6   : >> { %v2948_v49 = vmov %v1508_v48  ;;  %v2949_v55 = vmov %v1507_v46  ;;  %1376 = sbr.rel (!%p1374_p9) target bundleno = 562 (0x232), region = 118  ;;  %v1521_v1 = vadd.f32 (%p1374_p9), %v1513_v59, %v1507_v46  ;;  %v1522_v2 = vadd.f32 (%p1374_p9), %v1514_v61, %v1508_v48 }
 0x2c7   : >> { %v1484_v51 = vpop.f32.mrf.mxu2  ;;  %v1504_v52 = vpop.f32.mrf.mxu3 }
 0x2c8   : >> { %v1509_v53 = vadd.f32 %v2024_v45, %v1484_v51   ;;  %v1510_v54 = vadd.f32 %v2020_v38, %v1504_v52   ;;  %v1525_v11 = vmax.f32 (%p1374_p9), %v1521_v1, 0.0  ;;  %v1526_v12 = vmax.f32 (%p1374_p9), %v1522_v2, 0.0 }
 0x2ca   : >> { %v2946_v38 = vmov %v1510_v54  ;;  %v2947_v45 = vmov %v1509_v53  ;;  %v1523_v5 = vadd.f32 (%p1374_p9), %v1515_v62, %v1509_v53  ;;  %v1524_v7 = vadd.f32 (%p1374_p9), %v1516_v0, %v1510_v54 }
 0x2cb   : > { %v1533_v15 = vrot.slane %v1526_v12, 6 }
 0x2cc   : > { %v1527_v47 = vmax.f32 %v1523_v5, 0.0  ;;  %v1528_v14 = vmax.f32 %v1524_v7, 0.0 }
 0x2cd   : > { %v1537_v55 = vsel %vm1536_vm6, %v1525_v11, %v1533_v15 }
 0x2ce   : > { %v1534_v8 = vrot.slane %v1527_v47, 4  ;;  %v1535_v6 = vrot.slane %v1528_v14, 2 }
 0x2d0   : > { %v1539_v38 = vsel %vm1538_vm7, %v1534_v8, %v1535_v6 }
 0x2d1   : > { %v1541_v45 = vsel %vm1540_vm8, %v1537_v55, %v1539_v38 }
 0x2d2   : > { %1543 = vst [vmem:[#allocation13] sm:$0xff] %v1541_v45 }
 0x2d3 PF: > { %p1724_p10 = scmp.eq.s32.totalorder %s2094_s22, 7  ;;  %s2044_s28 = smov [#allocation13]  }
 0x2d4   : > { %s1550_s8 = sshll.u32 %s2044_s28, 4  ;;  %s1552_s6 = sshll.u32 %s2937_s5, 4  ;;  %s1551_s8 = int_to_ptr.vmem [resolvable:$true] %s1550_s8  ;;  %s1553_s6 = int_to_ptr.hbm [resolvable:$true] %s1552_s6 }
 0x2d5   : > { %1707 = dma.vmem_to_hbm [thread:$0]  (%p1724_p10), %s1551_s8, 128, %s1553_s6, [#allocation9]  }
 0x2d6   : > { %1999 = dma.done.wait (%p1724_p10), [#allocation9], 128  }
 0x2d7   : > { %2001 = vsyncadd (%p1724_p10), [#allocation9], 4294967168 }
 0x2d8 PF: > { %p19_p0 = scmp.ge.s32.totalorder %s2097_s23, 10   ;;  %s2950_s18 = smov %s2008_s19 }
 0x2d9   : > { %s2951_s19 = smov %s2012_s20  ;;  %s2952_s20 = smov %s2107_s26 }
 0x2da   : > { %s2953_s21 = smov %s2097_s23  ;;  %21 = sbr.rel (!%p19_p0) target bundleno = 8 (0x8), region = 129 }
 0x2df   :  { %1566 = vsyncpa [#allocation8], 1 }
 0x2e0   :  { %1568 = vsyncpa [#allocation8 + $0x1], 1 }
 0x2e1   :  { %1569 = vsyncpa [#allocation11], 1 }
 0x2e2   :  { %1571 = vsyncpa [#allocation11 + $0x1], 1 }
 0x2e3   :  { %1572 = vsyncpa [#allocation9], 1 }
 0x2e4   :  { %1574 = vsyncpa [#allocation9 + $0x1], 1 }
 0x2e5   :  { %1575 = vsyncmov [#allocation6] }
 0x2e8   :  { %s1576_s22 = vpop.sfrf %1575 }
 0x2e9   :  { %p1693_p2 = scmp.ne.s32.totalorder %s1576_s22, 0 }
 0x2eb   :  { %1580 = shalt.err (%p1693_p2)  }

</bundles_post_ra>
